<compile_context>
chip_gen: v5e
topology: v5e:2x2
jax: 0.10.0
libtpu: 0.0.40
codegen_flags: <defaults>
</compile_context>

<pallas_src>
import functools

import jax
import jax.numpy as jnp
from jax.experimental import pallas as pl
from jax.experimental.pallas import tpu as pltpu


def _dws_kernel(x_ref, top_ref, bot_ref, dw_w_ref, dw_b_ref,
                pw_w_ref, pw_b_ref, o_ref, xp_scr, *, matmul_dtype):
    """One (batch, row-strip) tile per grid step.  NHWC, channels on lanes.

    x_ref   : (1, TH, W, Cin)   row strip of the input (no halo)
    top_ref : (1, 1, W, Cin)    row above the strip (clamped; masked when h==0)
    bot_ref : (1, 1, W, Cin)    row below the strip (clamped; masked when h==last)
    dw_w_ref: (3, 3, Cin)       depthwise weights with BN scale folded in
    dw_b_ref: (1, Cin)          depthwise folded BN bias
    pw_w_ref: (Cin, Cout)       pointwise weights with BN scale folded in
    pw_b_ref: (1, Cout)         pointwise folded BN bias
    o_ref   : (1, TH*W, Cout)   lane-dense 2-D output slab
    xp_scr  : (TH+2, W+2, Cin)  VMEM scratch: zero-padded strip (+halo rows)
    """
    TH, W, Cin = x_ref.shape[1], x_ref.shape[2], x_ref.shape[3]
    Cout = o_ref.shape[2]
    h = pl.program_id(1)
    n_h = pl.num_programs(1)

    # Build the zero-padded strip in VMEM (no HBM-side jnp.pad round trip).
    xp_scr[...] = jnp.zeros_like(xp_scr)
    xp_scr[1:TH + 1, 1:W + 1, :] = x_ref[0].astype(xp_scr.dtype)

    @pl.when(h > 0)
    def _():
        xp_scr[0, 1:W + 1, :] = top_ref[0, 0].astype(xp_scr.dtype)

    @pl.when(h < n_h - 1)
    def _():
        xp_scr[TH + 1, 1:W + 1, :] = bot_ref[0, 0].astype(xp_scr.dtype)

    xp = xp_scr[...]                                  # (TH+2, W+2, Cin) f32
    dw_k = dw_w_ref[...].astype(jnp.float32)          # (3, 3, Cin)

    # Depthwise 3x3, stride 1.  Slice the W (sublane) axis once per column tap
    # and reuse across the three cheap leading-axis H shifts: 3 misaligned
    # slices per tile instead of 9.
    acc = jnp.zeros((TH, W, Cin), jnp.float32)
    for dw in range(3):
        xw = xp[:, dw:dw + W, :]                      # (TH+2, W, Cin)
        for dh in range(3):
            acc = acc + xw[dh:dh + TH, :, :] * dw_k[dh, dw, :]

    # BN scale already folded into dw_k -> just bias + ReLU.
    dw_out = jnp.maximum(acc + dw_b_ref[0].astype(jnp.float32), 0.0)

    # Pointwise 1x1 conv == channel matmul on the MXU (f32 accumulation).
    flat = dw_out.reshape(TH * W, Cin).astype(matmul_dtype)
    pw = jnp.dot(flat, pw_w_ref[...], preferred_element_type=jnp.float32)
    pw = jnp.maximum(pw + pw_b_ref[0].astype(jnp.float32), 0.0)

    o_ref[0] = pw.astype(o_ref.dtype)                 # lane-dense 2-D store


def _pick_tile_h(H, W):
    """Row-strip height: divides H, keeps the flattened (TH*W, Cout) output
    block sublane-aligned (TH*W % 8 == 0), and leaves >=2 strips so the grid
    has something to pipeline / shard across cores."""
    for th in (16, 8, 4, 2, 1):
        if H % th == 0 and (th * W) % 8 == 0 and th < H:
            return th
    return H


def dws_conv3x3_block(x_nchw,
                      dw_w, dw_gamma, dw_beta, dw_mean, dw_var,
                      pw_w, pw_gamma, pw_beta, pw_mean, pw_var,
                      eps=1e-5, matmul_dtype=jnp.float32):
    """Pallas implementation of DWSConv3x3Block.forward (eval-mode BN).

    matmul_dtype=jnp.bfloat16 on v6e/v7x gives ~3x MXU throughput on the
    pointwise stage (accumulation stays f32); keep f32 on v5e or for bitwise
    parity with an f32 reference.
    """
    N, Cin, H, W = x_nchw.shape
    Cout = pw_w.shape[0]

    # NCHW -> NHWC (channels on the lane axis).  No spatial padding here; the
    # 1-pixel zero border is built inside the kernel in VMEM.
    x = jnp.transpose(x_nchw, (0, 2, 3, 1))

    # Fold eval-mode BatchNorm: scale into the conv weights, bias separate.
    # TODO(synk): training-mode BN (batch statistics) is not reproduced here.
    dw_inv = dw_gamma / jnp.sqrt(dw_var + eps)                          # (Cin,)
    dw_k = (jnp.transpose(dw_w[:, 0, :, :], (1, 2, 0)) * dw_inv
            ).astype(jnp.float32)                                       # (3,3,Cin)
    dw_b = (dw_beta - dw_mean * dw_inv).reshape(1, Cin).astype(jnp.float32)

    pw_inv = pw_gamma / jnp.sqrt(pw_var + eps)                          # (Cout,)
    pw_k = (jnp.transpose(pw_w[:, :, 0, 0], (1, 0)) * pw_inv[None, :]
            ).astype(matmul_dtype)                                      # (Cin,Cout)
    pw_b = (pw_beta - pw_mean * pw_inv).reshape(1, Cout).astype(jnp.float32)

    TH = _pick_tile_h(H, W)
    n_h = H // TH

    kernel = functools.partial(_dws_kernel, matmul_dtype=matmul_dtype)

    out_flat = pl.pallas_call(
        kernel,
        out_shape=jax.ShapeDtypeStruct((N, H * W, Cout), x_nchw.dtype),
        grid=(N, n_h),
        in_specs=[
            # Main row strip (no halo).
            pl.BlockSpec((1, TH, W, Cin), lambda n, h: (n, h, 0, 0)),
            # One-row halos above/below the strip.  Indices are clamped at the
            # image border; the kernel masks them with pl.when so the border
            # stays zero-padded.
            pl.BlockSpec((1, 1, W, Cin),
                         lambda n, h: (n, jnp.maximum(h * TH - 1, 0), 0, 0)),
            pl.BlockSpec((1, 1, W, Cin),
                         lambda n, h: (n, jnp.minimum(h * TH + TH, H - 1), 0, 0)),
            # Weights / folded BN biases stay resident (constant index maps).
            pl.BlockSpec((3, 3, Cin), lambda n, h: (0, 0, 0)),
            pl.BlockSpec((1, Cin), lambda n, h: (0, 0)),
            pl.BlockSpec((Cin, Cout), lambda n, h: (0, 0)),
            pl.BlockSpec((1, Cout), lambda n, h: (0, 0)),
        ],
        out_specs=pl.BlockSpec((1, TH * W, Cout), lambda n, h: (n, h, 0)),
        scratch_shapes=[pltpu.VMEM((TH + 2, W + 2, Cin), jnp.float32)],
        compiler_params=pltpu.CompilerParams(
            dimension_semantics=("parallel", "parallel"),
            vmem_limit_bytes=32 * 1024 * 1024),
    )(x, x, x, dw_k, dw_b, pw_k, pw_b)

    out = out_flat.reshape(N, H, W, Cout)
    return jnp.transpose(out, (0, 3, 1, 2))   # back to NCHW


def ref_forward(x, dw_w, dw_gamma, dw_beta, dw_mean, dw_var,
                pw_w, pw_gamma, pw_beta, pw_mean, pw_var, eps=1e-5):
    """Pure-JAX reference matching PyTorch (eval-mode BN)."""
    Cin = x.shape[1]
    y = jax.lax.conv_general_dilated(
        x, dw_w, window_strides=(1, 1), padding=((1, 1), (1, 1)),
        dimension_numbers=("NCHW", "OIHW", "NCHW"), feature_group_count=Cin)
    y = (y - dw_mean[None, :, None, None]) / jnp.sqrt(dw_var + eps)[None, :, None, None]
    y = y * dw_gamma[None, :, None, None] + dw_beta[None, :, None, None]
    y = jnp.maximum(y, 0.0)
    z = jax.lax.conv_general_dilated(
        y, pw_w, window_strides=(1, 1), padding="VALID",
        dimension_numbers=("NCHW", "OIHW", "NCHW"))
    z = (z - pw_mean[None, :, None, None]) / jnp.sqrt(pw_var + eps)[None, :, None, None]
    z = z * pw_gamma[None, :, None, None] + pw_beta[None, :, None, None]
    return jnp.maximum(z, 0.0)


if __name__ == "__main__":
    N, Cin, Cout, H, W = 2, 4, 8, 16, 16
    key = jax.random.PRNGKey(0)
    keys = jax.random.split(key, 11)

    x = jax.random.normal(keys[0], (N, Cin, H, W), jnp.float32)

    # Depthwise conv weight (Cin, 1, 3, 3); BN params for Cin channels.
    dw_w = jax.random.normal(keys[1], (Cin, 1, 3, 3), jnp.float32) * 0.2
    dw_gamma = 1.0 + 0.1 * jax.random.normal(keys[2], (Cin,), jnp.float32)
    dw_beta = 0.1 * jax.random.normal(keys[3], (Cin,), jnp.float32)
    dw_mean = 0.1 * jax.random.normal(keys[4], (Cin,), jnp.float32)
    dw_var = jnp.abs(jax.random.normal(keys[5], (Cin,), jnp.float32)) + 0.5

    # Pointwise conv weight (Cout, Cin, 1, 1); BN params for Cout channels.
    pw_w = jax.random.normal(keys[6], (Cout, Cin, 1, 1), jnp.float32) * 0.2
    pw_gamma = 1.0 + 0.1 * jax.random.normal(keys[7], (Cout,), jnp.float32)
    pw_beta = 0.1 * jax.random.normal(keys[8], (Cout,), jnp.float32)
    pw_mean = 0.1 * jax.random.normal(keys[9], (Cout,), jnp.float32)
    pw_var = jnp.abs(jax.random.normal(keys[10], (Cout,), jnp.float32)) + 0.5

    ref = ref_forward(x, dw_w, dw_gamma, dw_beta, dw_mean, dw_var,
                      pw_w, pw_gamma, pw_beta, pw_mean, pw_var)

    # f32 path (exact parity with the PyTorch/XLA reference).
    out = dws_conv3x3_block(x, dw_w, dw_gamma, dw_beta, dw_mean, dw_var,
                            pw_w, pw_gamma, pw_beta, pw_mean, pw_var)
    out = jax.block_until_ready(out)
    assert out.shape == (N, Cout, H, W)
    assert jnp.allclose(out, ref, atol=1e-4, rtol=1e-4), (
        f"f32 max abs err = {jnp.max(jnp.abs(out - ref))}")

    # bf16 MXU-operand path (v6e/v7x recommendation), f32 accumulation.
    out_bf16 = dws_conv3x3_block(x, dw_w, dw_gamma, dw_beta, dw_mean, dw_var,
                                 pw_w, pw_gamma, pw_beta, pw_mean, pw_var,
                                 matmul_dtype=jnp.bfloat16)
    out_bf16 = jax.block_until_ready(out_bf16)
    assert jnp.allclose(out_bf16, ref, atol=1e-1, rtol=1e-1), (
        f"bf16 max abs err = {jnp.max(jnp.abs(out_bf16 - ref))}")

    print("KERNEL_OK")
</pallas_src>

<mosaic_0001>
module attributes {stable_mosaic.version = 11 : i64} {
  func.func @_dws_kernel(%arg0: i32, %arg1: i32, %arg2: memref<1x8x16x4xf32, #tpu.memory_space<vmem>>, %arg3: memref<1x1x16x4xf32, #tpu.memory_space<vmem>>, %arg4: memref<1x1x16x4xf32, #tpu.memory_space<vmem>>, %arg5: memref<3x3x4xf32, #tpu.memory_space<vmem>>, %arg6: memref<1x4xf32, #tpu.memory_space<vmem>>, %arg7: memref<4x8xf32, #tpu.memory_space<vmem>>, %arg8: memref<1x8xf32, #tpu.memory_space<vmem>>, %arg9: memref<1x128x8xf32, #tpu.memory_space<vmem>>, %arg10: memref<10x18x4xf32, #tpu.memory_space<vmem>>) attributes {dimension_semantics = [#tpu.dimension_semantics<parallel>, #tpu.dimension_semantics<parallel>], iteration_bounds = array<i64: 2, 2>, scalar_prefetch = 0 : i64, scratch_operands = 1 : i64, tpu.core_type = #tpu.core_type<tc>, window_params = [{transform_indices = @transform_0, window_bounds = array<i64: 1, 8, 16, 4>}, {transform_indices = @transform_1, window_bounds = array<i64: 1, 1, 16, 4>}, {transform_indices = @transform_2, window_bounds = array<i64: 1, 1, 16, 4>}, {pipeline_mode = #tpu.pipeline_mode<synchronous>, transform_indices = @transform_3, window_bounds = array<i64: 3, 3, 4>}, {pipeline_mode = #tpu.pipeline_mode<synchronous>, transform_indices = @transform_4, window_bounds = array<i64: 1, 4>}, {pipeline_mode = #tpu.pipeline_mode<synchronous>, transform_indices = @transform_5, window_bounds = array<i64: 4, 8>}, {pipeline_mode = #tpu.pipeline_mode<synchronous>, transform_indices = @transform_6, window_bounds = array<i64: 1, 8>}, {transform_indices = @transform_7, window_bounds = array<i64: 1, 128, 8>}]} {
    %cst = arith.constant 0.000000e+00 : f32
    %0 = vector.broadcast %cst : f32 to vector<10x18x4xf32>
    %c0 = arith.constant 0 : index
    %c0_0 = arith.constant 0 : index
    %c0_1 = arith.constant 0 : index
    %1 = vector.load %arg10[%c0, %c0_0, %c0_1] : memref<10x18x4xf32, #tpu.memory_space<vmem>>, vector<10x18x4xf32>
    tpu.vector_store %arg10[%c0, %c0_0, %c0_1], %0 {strides = array<i32>} : memref<10x18x4xf32, #tpu.memory_space<vmem>>, vector<10x18x4xf32>,
    %c0_2 = arith.constant 0 : index
    %c0_3 = arith.constant 0 : index
    %c0_4 = arith.constant 0 : index
    %c0_5 = arith.constant 0 : index
    %2 = vector.load %arg2[%c0_2, %c0_3, %c0_4, %c0_5] : memref<1x8x16x4xf32, #tpu.memory_space<vmem>>, vector<1x8x16x4xf32>
    %3 = vector.shape_cast %2 : vector<1x8x16x4xf32> to vector<8x16x4xf32>
    %c1 = arith.constant 1 : index
    %c1_6 = arith.constant 1 : index
    %c0_7 = arith.constant 0 : index
    %4 = vector.load %arg10[%c1, %c1_6, %c0_7] : memref<10x18x4xf32, #tpu.memory_space<vmem>>, vector<8x16x4xf32>
    tpu.vector_store %arg10[%c1, %c1_6, %c0_7], %3 {strides = array<i32>} : memref<10x18x4xf32, #tpu.memory_space<vmem>>, vector<8x16x4xf32>,
    %c0_i32 = arith.constant 0 : i32
    %5 = arith.cmpi sgt, %arg1, %c0_i32 : i32
    %6 = arith.extui %5 : i1 to i32
    %c0_i32_8 = arith.constant 0 : i32
    %7 = arith.cmpi ne, %6, %c0_i32_8 : i32
    scf.if %7 {
      %c0_29 = arith.constant 0 : index
      %c0_30 = arith.constant 0 : index
      %c0_31 = arith.constant 0 : index
      %c0_32 = arith.constant 0 : index
      %100 = vector.load %arg3[%c0_29, %c0_30, %c0_31, %c0_32] : memref<1x1x16x4xf32, #tpu.memory_space<vmem>>, vector<1x1x16x4xf32>
      %101 = vector.shape_cast %100 : vector<1x1x16x4xf32> to vector<16x4xf32>
      %c0_33 = arith.constant 0 : index
      %c1_34 = arith.constant 1 : index
      %c0_35 = arith.constant 0 : index
      %102 = vector.load %arg10[%c0_33, %c1_34, %c0_35] : memref<10x18x4xf32, #tpu.memory_space<vmem>>, vector<1x16x4xf32>
      %103 = vector.shape_cast %102 : vector<1x16x4xf32> to vector<16x4xf32>
      %104 = vector.shape_cast %101 : vector<16x4xf32> to vector<1x16x4xf32>
      tpu.vector_store %arg10[%c0_33, %c1_34, %c0_35], %104 {strides = array<i32>} : memref<10x18x4xf32, #tpu.memory_space<vmem>>, vector<1x16x4xf32>,
    } else {
    }
    %c1_i32 = arith.constant 1 : i32
    %8 = arith.cmpi slt, %arg1, %c1_i32 : i32
    %9 = arith.extui %8 : i1 to i32
    %c0_i32_9 = arith.constant 0 : i32
    %10 = arith.cmpi ne, %9, %c0_i32_9 : i32
    scf.if %10 {
      %c0_29 = arith.constant 0 : index
      %c0_30 = arith.constant 0 : index
      %c0_31 = arith.constant 0 : index
      %c0_32 = arith.constant 0 : index
      %100 = vector.load %arg4[%c0_29, %c0_30, %c0_31, %c0_32] : memref<1x1x16x4xf32, #tpu.memory_space<vmem>>, vector<1x1x16x4xf32>
      %101 = vector.shape_cast %100 : vector<1x1x16x4xf32> to vector<16x4xf32>
      %c9 = arith.constant 9 : index
      %c1_33 = arith.constant 1 : index
      %c0_34 = arith.constant 0 : index
      %102 = vector.load %arg10[%c9, %c1_33, %c0_34] : memref<10x18x4xf32, #tpu.memory_space<vmem>>, vector<1x16x4xf32>
      %103 = vector.shape_cast %102 : vector<1x16x4xf32> to vector<16x4xf32>
      %104 = vector.shape_cast %101 : vector<16x4xf32> to vector<1x16x4xf32>
      tpu.vector_store %arg10[%c9, %c1_33, %c0_34], %104 {strides = array<i32>} : memref<10x18x4xf32, #tpu.memory_space<vmem>>, vector<1x16x4xf32>,
    } else {
    }
    %c0_10 = arith.constant 0 : index
    %c0_11 = arith.constant 0 : index
    %c0_12 = arith.constant 0 : index
    %11 = vector.load %arg10[%c0_10, %c0_11, %c0_12] : memref<10x18x4xf32, #tpu.memory_space<vmem>>, vector<10x18x4xf32>
    %c0_13 = arith.constant 0 : index
    %c0_14 = arith.constant 0 : index
    %c0_15 = arith.constant 0 : index
    %12 = vector.load %arg5[%c0_13, %c0_14, %c0_15] : memref<3x3x4xf32, #tpu.memory_space<vmem>>, vector<3x3x4xf32>
    %cst_16 = arith.constant 0.000000e+00 : f32
    %13 = vector.broadcast %cst_16 : f32 to vector<8x16x4xf32>
    %14 = vector.extract_strided_slice %11 {offsets = [0, 0, 0], sizes = [10, 16, 4], strides = [1, 1, 1]} : vector<10x18x4xf32> to vector<10x16x4xf32>
    %15 = vector.extract_strided_slice %14 {offsets = [0, 0, 0], sizes = [8, 16, 4], strides = [1, 1, 1]} : vector<10x16x4xf32> to vector<8x16x4xf32>
    %16 = vector.extract_strided_slice %12 {offsets = [0, 0, 0], sizes = [1, 1, 4], strides = [1, 1, 1]} : vector<3x3x4xf32> to vector<1x1x4xf32>
    %17 = vector.shape_cast %16 : vector<1x1x4xf32> to vector<4xf32>
    %18 = vector.shape_cast %17 : vector<4xf32> to vector<1x1x4xf32>
    %19 = vector.broadcast %18 : vector<1x1x4xf32> to vector<8x16x4xf32>
    %20 = arith.mulf %15, %19 : vector<8x16x4xf32>
    %21 = arith.addf %13, %20 : vector<8x16x4xf32>
    %22 = vector.extract_strided_slice %14 {offsets = [1, 0, 0], sizes = [8, 16, 4], strides = [1, 1, 1]} : vector<10x16x4xf32> to vector<8x16x4xf32>
    %23 = vector.extract_strided_slice %12 {offsets = [1, 0, 0], sizes = [1, 1, 4], strides = [1, 1, 1]} : vector<3x3x4xf32> to vector<1x1x4xf32>
    %24 = vector.shape_cast %23 : vector<1x1x4xf32> to vector<4xf32>
    %25 = vector.shape_cast %24 : vector<4xf32> to vector<1x1x4xf32>
    %26 = vector.broadcast %25 : vector<1x1x4xf32> to vector<8x16x4xf32>
    %27 = arith.mulf %22, %26 : vector<8x16x4xf32>
    %28 = arith.addf %21, %27 : vector<8x16x4xf32>
    %29 = vector.extract_strided_slice %14 {offsets = [2, 0, 0], sizes = [8, 16, 4], strides = [1, 1, 1]} : vector<10x16x4xf32> to vector<8x16x4xf32>
    %30 = vector.extract_strided_slice %12 {offsets = [2, 0, 0], sizes = [1, 1, 4], strides = [1, 1, 1]} : vector<3x3x4xf32> to vector<1x1x4xf32>
    %31 = vector.shape_cast %30 : vector<1x1x4xf32> to vector<4xf32>
    %32 = vector.shape_cast %31 : vector<4xf32> to vector<1x1x4xf32>
    %33 = vector.broadcast %32 : vector<1x1x4xf32> to vector<8x16x4xf32>
    %34 = arith.mulf %29, %33 : vector<8x16x4xf32>
    %35 = arith.addf %28, %34 : vector<8x16x4xf32>
    %36 = vector.extract_strided_slice %11 {offsets = [0, 1, 0], sizes = [10, 16, 4], strides = [1, 1, 1]} : vector<10x18x4xf32> to vector<10x16x4xf32>
    %37 = vector.extract_strided_slice %36 {offsets = [0, 0, 0], sizes = [8, 16, 4], strides = [1, 1, 1]} : vector<10x16x4xf32> to vector<8x16x4xf32>
    %38 = vector.extract_strided_slice %12 {offsets = [0, 1, 0], sizes = [1, 1, 4], strides = [1, 1, 1]} : vector<3x3x4xf32> to vector<1x1x4xf32>
    %39 = vector.shape_cast %38 : vector<1x1x4xf32> to vector<4xf32>
    %40 = vector.shape_cast %39 : vector<4xf32> to vector<1x1x4xf32>
    %41 = vector.broadcast %40 : vector<1x1x4xf32> to vector<8x16x4xf32>
    %42 = arith.mulf %37, %41 : vector<8x16x4xf32>
    %43 = arith.addf %35, %42 : vector<8x16x4xf32>
    %44 = vector.extract_strided_slice %36 {offsets = [1, 0, 0], sizes = [8, 16, 4], strides = [1, 1, 1]} : vector<10x16x4xf32> to vector<8x16x4xf32>
    %45 = vector.extract_strided_slice %12 {offsets = [1, 1, 0], sizes = [1, 1, 4], strides = [1, 1, 1]} : vector<3x3x4xf32> to vector<1x1x4xf32>
    %46 = vector.shape_cast %45 : vector<1x1x4xf32> to vector<4xf32>
    %47 = vector.shape_cast %46 : vector<4xf32> to vector<1x1x4xf32>
    %48 = vector.broadcast %47 : vector<1x1x4xf32> to vector<8x16x4xf32>
    %49 = arith.mulf %44, %48 : vector<8x16x4xf32>
    %50 = arith.addf %43, %49 : vector<8x16x4xf32>
    %51 = vector.extract_strided_slice %36 {offsets = [2, 0, 0], sizes = [8, 16, 4], strides = [1, 1, 1]} : vector<10x16x4xf32> to vector<8x16x4xf32>
    %52 = vector.extract_strided_slice %12 {offsets = [2, 1, 0], sizes = [1, 1, 4], strides = [1, 1, 1]} : vector<3x3x4xf32> to vector<1x1x4xf32>
    %53 = vector.shape_cast %52 : vector<1x1x4xf32> to vector<4xf32>
    %54 = vector.shape_cast %53 : vector<4xf32> to vector<1x1x4xf32>
    %55 = vector.broadcast %54 : vector<1x1x4xf32> to vector<8x16x4xf32>
    %56 = arith.mulf %51, %55 : vector<8x16x4xf32>
    %57 = arith.addf %50, %56 : vector<8x16x4xf32>
    %58 = vector.extract_strided_slice %11 {offsets = [0, 2, 0], sizes = [10, 16, 4], strides = [1, 1, 1]} : vector<10x18x4xf32> to vector<10x16x4xf32>
    %59 = vector.extract_strided_slice %58 {offsets = [0, 0, 0], sizes = [8, 16, 4], strides = [1, 1, 1]} : vector<10x16x4xf32> to vector<8x16x4xf32>
    %60 = vector.extract_strided_slice %12 {offsets = [0, 2, 0], sizes = [1, 1, 4], strides = [1, 1, 1]} : vector<3x3x4xf32> to vector<1x1x4xf32>
    %61 = vector.shape_cast %60 : vector<1x1x4xf32> to vector<4xf32>
    %62 = vector.shape_cast %61 : vector<4xf32> to vector<1x1x4xf32>
    %63 = vector.broadcast %62 : vector<1x1x4xf32> to vector<8x16x4xf32>
    %64 = arith.mulf %59, %63 : vector<8x16x4xf32>
    %65 = arith.addf %57, %64 : vector<8x16x4xf32>
    %66 = vector.extract_strided_slice %58 {offsets = [1, 0, 0], sizes = [8, 16, 4], strides = [1, 1, 1]} : vector<10x16x4xf32> to vector<8x16x4xf32>
    %67 = vector.extract_strided_slice %12 {offsets = [1, 2, 0], sizes = [1, 1, 4], strides = [1, 1, 1]} : vector<3x3x4xf32> to vector<1x1x4xf32>
    %68 = vector.shape_cast %67 : vector<1x1x4xf32> to vector<4xf32>
    %69 = vector.shape_cast %68 : vector<4xf32> to vector<1x1x4xf32>
    %70 = vector.broadcast %69 : vector<1x1x4xf32> to vector<8x16x4xf32>
    %71 = arith.mulf %66, %70 : vector<8x16x4xf32>
    %72 = arith.addf %65, %71 : vector<8x16x4xf32>
    %73 = vector.extract_strided_slice %58 {offsets = [2, 0, 0], sizes = [8, 16, 4], strides = [1, 1, 1]} : vector<10x16x4xf32> to vector<8x16x4xf32>
    %74 = vector.extract_strided_slice %12 {offsets = [2, 2, 0], sizes = [1, 1, 4], strides = [1, 1, 1]} : vector<3x3x4xf32> to vector<1x1x4xf32>
    %75 = vector.shape_cast %74 : vector<1x1x4xf32> to vector<4xf32>
    %76 = vector.shape_cast %75 : vector<4xf32> to vector<1x1x4xf32>
    %77 = vector.broadcast %76 : vector<1x1x4xf32> to vector<8x16x4xf32>
    %78 = arith.mulf %73, %77 : vector<8x16x4xf32>
    %79 = arith.addf %72, %78 : vector<8x16x4xf32>
    %c0_17 = arith.constant 0 : index
    %c0_18 = arith.constant 0 : index
    %80 = vector.load %arg6[%c0_17, %c0_18] : memref<1x4xf32, #tpu.memory_space<vmem>>, vector<1x4xf32>
    %81 = vector.shape_cast %80 : vector<1x4xf32> to vector<4xf32>
    %82 = vector.shape_cast %81 : vector<4xf32> to vector<1x1x4xf32>
    %83 = vector.broadcast %82 : vector<1x1x4xf32> to vector<8x16x4xf32>
    %84 = arith.addf %79, %83 : vector<8x16x4xf32>
    %cst_19 = arith.constant 0.000000e+00 : f32
    %85 = vector.broadcast %cst_19 : f32 to vector<8x16x4xf32>
    %86 = arith.maximumf %84, %85 : vector<8x16x4xf32>
    %87 = vector.shape_cast %86 : vector<8x16x4xf32> to vector<128x4xf32>
    %c0_20 = arith.constant 0 : index
    %c0_21 = arith.constant 0 : index
    %88 = vector.load %arg7[%c0_20, %c0_21] : memref<4x8xf32, #tpu.memory_space<vmem>>, vector<4x8xf32>
    %cst_22 = arith.constant dense<0.000000e+00> : vector<128x8xf32>
    %89 = tpu.matmul %87, %88, %cst_22 {dimension_numbers = #tpu.dot_dimension_numbers<[1], [0], [0], [1], [0, 0, 1, 1], [], []>} : vector<128x4xf32>, vector<4x8xf32>, vector<128x8xf32> -> vector<128x8xf32>
    %c0_23 = arith.constant 0 : index
    %c0_24 = arith.constant 0 : index
    %90 = vector.load %arg8[%c0_23, %c0_24] : memref<1x8xf32, #tpu.memory_space<vmem>>, vector<1x8xf32>
    %91 = vector.shape_cast %90 : vector<1x8xf32> to vector<8xf32>
    %92 = vector.shape_cast %91 : vector<8xf32> to vector<1x8xf32>
    %93 = vector.broadcast %92 : vector<1x8xf32> to vector<128x8xf32>
    %94 = arith.addf %89, %93 : vector<128x8xf32>
    %cst_25 = arith.constant 0.000000e+00 : f32
    %95 = vector.broadcast %cst_25 : f32 to vector<128x8xf32>
    %96 = arith.maximumf %94, %95 : vector<128x8xf32>
    %c0_26 = arith.constant 0 : index
    %c0_27 = arith.constant 0 : index
    %c0_28 = arith.constant 0 : index
    %97 = vector.load %arg9[%c0_26, %c0_27, %c0_28] : memref<1x128x8xf32, #tpu.memory_space<vmem>>, vector<1x128x8xf32>
    %98 = vector.shape_cast %97 : vector<1x128x8xf32> to vector<128x8xf32>
    %99 = vector.shape_cast %96 : vector<128x8xf32> to vector<1x128x8xf32>
    tpu.vector_store %arg9[%c0_26, %c0_27, %c0_28], %99 {strides = array<i32>} : memref<1x128x8xf32, #tpu.memory_space<vmem>>, vector<1x128x8xf32>,
    return
  }
  func.func @transform_0(%arg0: i32, %arg1: i32) -> (i32, i32, i32, i32) {
    %c0_i32 = arith.constant 0 : i32
    %c0_i32_0 = arith.constant 0 : i32
    %c0_i32_1 = arith.constant 0 : i32
    return %arg0, %arg1, %c0_i32, %c0_i32_0 : i32, i32, i32, i32
  }
  func.func @transform_1(%arg0: i32, %arg1: i32) -> (i32, i32, i32, i32) {
    %c8_i32 = arith.constant 8 : i32
    %0 = arith.muli %arg1, %c8_i32 : i32
    %c1_i32 = arith.constant 1 : i32
    %1 = arith.subi %0, %c1_i32 : i32
    %c0_i32 = arith.constant 0 : i32
    %2 = arith.maxsi %1, %c0_i32 : i32
    %c0_i32_0 = arith.constant 0 : i32
    %c0_i32_1 = arith.constant 0 : i32
    %c0_i32_2 = arith.constant 0 : i32
    return %arg0, %2, %c0_i32_0, %c0_i32_1 : i32, i32, i32, i32
  }
  func.func @transform_2(%arg0: i32, %arg1: i32) -> (i32, i32, i32, i32) {
    %c8_i32 = arith.constant 8 : i32
    %0 = arith.muli %arg1, %c8_i32 : i32
    %c8_i32_0 = arith.constant 8 : i32
    %1 = arith.addi %0, %c8_i32_0 : i32
    %c15_i32 = arith.constant 15 : i32
    %2 = arith.minsi %1, %c15_i32 : i32
    %c0_i32 = arith.constant 0 : i32
    %c0_i32_1 = arith.constant 0 : i32
    %c0_i32_2 = arith.constant 0 : i32
    return %arg0, %2, %c0_i32, %c0_i32_1 : i32, i32, i32, i32
  }
  func.func @transform_3(%arg0: i32, %arg1: i32) -> (i32, i32, i32) {
    %c0_i32 = arith.constant 0 : i32
    %c0_i32_0 = arith.constant 0 : i32
    %c0_i32_1 = arith.constant 0 : i32
    %c0_i32_2 = arith.constant 0 : i32
    return %c0_i32, %c0_i32_0, %c0_i32_1 : i32, i32, i32
  }
  func.func @transform_4(%arg0: i32, %arg1: i32) -> (i32, i32) {
    %c0_i32 = arith.constant 0 : i32
    %c0_i32_0 = arith.constant 0 : i32
    %c0_i32_1 = arith.constant 0 : i32
    return %c0_i32, %c0_i32_0 : i32, i32
  }
  func.func @transform_5(%arg0: i32, %arg1: i32) -> (i32, i32) {
    %c0_i32 = arith.constant 0 : i32
    %c0_i32_0 = arith.constant 0 : i32
    %c0_i32_1 = arith.constant 0 : i32
    return %c0_i32, %c0_i32_0 : i32, i32
  }
  func.func @transform_6(%arg0: i32, %arg1: i32) -> (i32, i32) {
    %c0_i32 = arith.constant 0 : i32
    %c0_i32_0 = arith.constant 0 : i32
    %c0_i32_1 = arith.constant 0 : i32
    return %c0_i32, %c0_i32_0 : i32, i32
  }
  func.func @transform_7(%arg0: i32, %arg1: i32) -> (i32, i32, i32) {
    %c0_i32 = arith.constant 0 : i32
    %c0_i32_0 = arith.constant 0 : i32
    return %arg0, %arg1, %c0_i32 : i32, i32, i32
  }
}

</mosaic_0001>

<bundles_post_ra>
// kernel: tpu_custom_call.1
= control target key start
LH: loop header
LB: loop body
LE: loop exit
PB: predicated region body
PF: predicated region fallthrough
CT: control target
= control target key end

     0   :  { %s1901_s24 = smov 0   ;;  %s1903_s25 = smov 0   ;;  %s3072_s0 = inlined_call_operand.vmem [shape: f32[2,16,16,4], index: 0, kind: input, shape index: {}]   ;;  %s3073_s1 = inlined_call_operand.vmem [shape: f32[2,16,16,4], index: 1, kind: input, shape index: {}]   ;;  %s3074_s2 = inlined_call_operand.vmem [shape: f32[2,16,16,4], index: 2, kind: input, shape index: {}]   ;;  %s3075_s3 = inlined_call_operand.vmem [shape: f32[3,3,4], index: 3, kind: input, shape index: {}]   ;;  %s3076_s4 = inlined_call_operand.vmem [shape: f32[1,4], index: 4, kind: input, shape index: {}]   ;;  %s3077_s5 = inlined_call_operand.vmem [shape: f32[4,8], index: 5, kind: input, shape index: {}]   ;;  %s3078_s6 = inlined_call_operand.vmem [shape: f32[1,8], index: 6, kind: input, shape index: {}]   ;;  %s3079_s7 = inlined_call_operand.vmem [shape: f32[2,256,8], index: 7, kind: output, shape index: {}]  }
   0x1   :  { %s1905_s26 = smov 0   ;;  %s1907_s27 = smov 0  }
   0x2   :  { %s1909_s28 = smov 0  }
   0x3 LB: > { %s26_s29 = sadd.s32 1, %s1850_s26  ;;  %s29_s30 = sadd.s32 1, %s1854_s27  ;;  %s1858_s28 = sphi %s1909_s28, %s17_s28   ;;  %s1854_s27 = sphi %s1907_s27, %s3251_s27   ;;  %s1850_s26 = sphi %s1905_s26, %s3250_s26   ;;  %s1846_s25 = sphi %s1903_s25, %s3249_s25   ;;  %s1842_s24 = sphi %s1901_s24, %s3248_s24  }
   0x4   : > { %p27_p0 = scmp.ge.s32.totalorder %s26_s29, 2  ;;  %p1723_p1 = scmp.ge.s32.totalorder %s1858_s28, 1 }
   0x5   : > { %p323_p2 = scmp.lt.s32.totalorder %s1858_s28, 5 }
   0x6   : > { %s3253_s29 = smov (%p27_p0, %s26_s29), 0  ;;  %s3255_s30 = smov (!%p27_p0, %s29_s30), %s1854_s27 }
   0x7   : > { %p324_p3 = pnand %p1723_p1, %p323_p2  ;;  %p31_p4 = scmp.ge.s32.totalorder %s3255_s30, 2 }
   0x9   : > { %s3257_s30 = smov (%p31_p4, %s3255_s30), 0  ;;  %327 = sbr.rel (%p324_p3) target bundleno = 381 (0x17d), region = 48 }
   0xe   : > { %vm445_vm0 = vcmask 31744   ;;  %s1724_s8 = sshll.u32 %s1842_s24, 3  ;;  %p391_p5 = scmp.lt.s32.totalorder %s1846_s25, 1  ;;  %v1860_v0 = vmov 0.0   ;;  %vm448_vm1 = vcmask 25600  }
   0xf   : > { %450 = vst.msk [vmem:[#allocation2 + $0x18] sm:$0xff] %vm445_vm0, %v1860_v0  ;;  %p393_p6 = scmp.lt.s32.totalorder %s1724_s8, 15  ;;  %s1729_s9 = sadd.s32 4294967295, %s1724_s8 }
  0x10   : > { %446 = vst.msk [vmem:[#allocation2] sm:$0xff] %vm445_vm0, %v1860_v0  ;;  %s3259_s25 = smov (!%p391_p5, %s1846_s25), 1  ;;  %p403_p7 = scmp.gt.s32.totalorder %s1729_s9, 0 }
  0x11   : > { %447 = vst.msk [vmem:[#allocation2 + $0x8] sm:$0xff] %vm445_vm0, %v1860_v0  ;;  %s1942_s10 = scalar_select %p393_p6, %s1724_s8, 15 }
  0x12   : > { %451 = vst.msk [vmem:[#allocation2 + $0x20] sm:$0xff] %vm445_vm0, %v1860_v0  ;;  %s1948_s11 = sshll.u32 %s3259_s25, 5  ;;  %s419_s12 = sadd.s32 8, %s1724_s8 }
  0x13   : > { %453 = vst.msk [vmem:[#allocation2 + $0x30] sm:$0xff] %vm445_vm0, %v1860_v0  ;;  %p1730_p8 = scmp.lt.s32.totalorder %s1729_s9, 15  ;;  %p1952_p9 = scmp.lt.s32.totalorder %s419_s12, 15 }
  0x14   : > { %454 = vst.msk [vmem:[#allocation2 + $0x38] sm:$0xff] %vm445_vm0, %v1860_v0  ;;  %s1725_s14 = sshll.u32 %s1942_s10, 1  ;;  %s1745_s15 = sshll.u32 %s1842_s24, 4 }
  0x15   : > { %456 = vst.msk [vmem:[#allocation2 + $0x48] sm:$0xff] %vm445_vm0, %v1860_v0  ;;  %s3261_s9 = smov (!%p403_p7, %s1729_s9), 0  ;;  %s3263_s12 = smov (!%p1952_p9, %s419_s12), 15 }
  0x16   : > { %457 = vst.msk [vmem:[#allocation2 + $0x50] sm:$0xff] %vm445_vm0, %v1860_v0  ;;  %s3265_s9 = smov (!%p1730_p8, %s3261_s9), 15  ;;  %s3267_s12 = smov (!%p1952_p9, %s3263_s12), 15 }
  0x17   : > { %459 = vst.msk [vmem:[#allocation2 + $0x60] sm:$0xff] %vm445_vm0, %v1860_v0  ;;  %s1735_s16 = sshll.u32 %s3265_s9, 1  ;;  %p1974_p10 = scmp.lt.s32.totalorder %s1745_s15, 31 }
  0x18   : > { %460 = vst.msk [vmem:[#allocation2 + $0x68] sm:$0xff] %vm445_vm0, %v1860_v0  ;;  %s411_s18 = sadd.s32 %s1735_s16, %s1948_s11  ;;  %s1742_s19 = sshll.u32 %s3267_s12, 1 }
  0x19   : > { %462 = vst.msk [vmem:[#allocation2 + $0x78] sm:$0xff] %vm445_vm0, %v1860_v0  ;;  %s1737_s20 = sshll.u32 %s411_s18, 3  ;;  %s428_s21 = sadd.s32 %s1742_s19, %s1948_s11 }
  0x1a   : > { %463 = vst.msk [vmem:[#allocation2 + $0x80] sm:$0xff] %vm445_vm0, %v1860_v0  ;;  %s1989_s25 = scalar_lea.vmem %s3073_s1, %s1737_s20  ;;  %s1744_s8 = sshll.u32 %s428_s21, 3 }
  0x1b   : > { %465 = vst.msk [vmem:[#allocation2 + $0x90] sm:$0xff] %vm445_vm0, %v1860_v0  ;;  %s1996_s12 = scalar_lea.vmem %s3074_s2, %s1744_s8  ;;  %s3269_s15 = smov (!%p1974_p10, %s1745_s15), 31 }
  0x1c   : > { %466 = vst.msk [vmem:[#allocation2 + $0x98] sm:$0xff] %vm445_vm0, %v1860_v0  ;;  %s397_s13 = sadd.s32 %s1948_s11, %s1725_s14  ;;  %s441_s16 = sadd.s32 %s1948_s11, %s3269_s15 }
  0x1d   : > { %468 = vst.msk [vmem:[#allocation2 + $0xa8] sm:$0xff] %vm445_vm0, %v1860_v0  ;;  %s1747_s18 = sshll.u32 %s441_s16, 3  ;;  %s1727_s19 = sshll.u32 %s397_s13, 3 }
  0x1e   : > { %469 = vst.msk [vmem:[#allocation2 + $0xb0] sm:$0xff] %vm445_vm0, %v1860_v0  ;;  %s2015_s17 = scalar_lea.vmem %s3079_s7, %s1747_s18  ;;  %s2026_s15 = scalar_lea.vmem %s3072_s0, %s1727_s19 }
  0x1f   : > { %471 = vst.msk [vmem:[#allocation2 + $0xc0] sm:$0xff] %vm445_vm0, %v1860_v0  ;;  %v477_v1 = vld [vmem:[%s2026_s15] sm:$0xff]  ;;  %v478_v2 = vld [vmem:[%s2026_s15 + $0x8] sm:$0xff]  ;;  %v479_v3 = vld [vmem:[%s2026_s15 + $0x10] sm:$0xff]  ;;  %p1748_p11 = scmp.le.s32.totalorder %s1842_s24, 0 }
  0x20   : > { %472 = vst.msk [vmem:[#allocation2 + $0xc8] sm:$0xff] %vm445_vm0, %v1860_v0  ;;  %v480_v4 = vld [vmem:[%s2026_s15 + $0x18] sm:$0xff]  ;;  %v481_v5 = vld [vmem:[%s2026_s15 + $0x20] sm:$0xff]  ;;  %v482_v6 = vld [vmem:[%s2026_s15 + $0x28] sm:$0xff] }
  0x21   : > { %474 = vst.msk [vmem:[#allocation2 + $0xd8] sm:$0xff] %vm445_vm0, %v1860_v0  ;;  %v483_v7 = vld [vmem:[%s2026_s15 + $0x30] sm:$0xff]  ;;  %v484_v8 = vld [vmem:[%s2026_s15 + $0x38] sm:$0xff]  ;;  %v485_v9 = vld [vmem:[%s2026_s15 + $0x40] sm:$0xff] }
  0x22   : > { %475 = vst.msk [vmem:[#allocation2 + $0xe0] sm:$0xff] %vm445_vm0, %v1860_v0  ;;  %v486_v10 = vld [vmem:[%s2026_s15 + $0x48] sm:$0xff]  ;;  %v487_v11 = vld [vmem:[%s2026_s15 + $0x50] sm:$0xff]  ;;  %v488_v12 = vld [vmem:[%s2026_s15 + $0x58] sm:$0xff] }
  0x23   : > { %452 = vst.msk [vmem:[#allocation2 + $0x28] sm:$0x3] %vm448_vm1, %v1860_v0  ;;  %v489_v13 = vld [vmem:[%s2026_s15 + $0x60] sm:$0xff]  ;;  %v490_v14 = vld [vmem:[%s2026_s15 + $0x68] sm:$0xff]  ;;  %v491_v15 = vld [vmem:[%s2026_s15 + $0x70] sm:$0xff] }
  0x24   : > { %449 = vst.msk [vmem:[#allocation2 + $0x10] sm:$0x3] %vm448_vm1, %v1860_v0  ;;  %v492_v16 = vld [vmem:[%s2026_s15 + $0x78] sm:$0xff] }
  0x25   : > { %455 = vst.msk [vmem:[#allocation2 + $0x40] sm:$0x3] %vm448_vm1, %v1860_v0 }
  0x26   : > { %458 = vst.msk [vmem:[#allocation2 + $0x58] sm:$0x3] %vm448_vm1, %v1860_v0 }
  0x27   : > { %461 = vst.msk [vmem:[#allocation2 + $0x70] sm:$0x3] %vm448_vm1, %v1860_v0 }
  0x28   : > { %464 = vst.msk [vmem:[#allocation2 + $0x88] sm:$0x3] %vm448_vm1, %v1860_v0 }
  0x29   : > { %467 = vst.msk [vmem:[#allocation2 + $0xa0] sm:$0x3] %vm448_vm1, %v1860_v0 }
  0x2a   : > { %470 = vst.msk [vmem:[#allocation2 + $0xb8] sm:$0x3] %vm448_vm1, %v1860_v0 }
  0x2b   : > { %473 = vst.msk [vmem:[#allocation2 + $0xd0] sm:$0x3] %vm448_vm1, %v1860_v0 }
  0x2c   : > { %476 = vst.msk [vmem:[#allocation2 + $0xe8] sm:$0x3] %vm448_vm1, %v1860_v0 }
  0x2d   : > { %494 = vst.msk [vmem:[#allocation2 + $0x19] sm:$0xff] %vm445_vm0, %v477_v1 }
  0x2e   : > { %495 = vst.msk [vmem:[#allocation2 + $0x21] sm:$0xff] %vm445_vm0, %v478_v2 }
  0x2f   : > { %496 = vst.msk [vmem:[#allocation2 + $0x31] sm:$0xff] %vm445_vm0, %v479_v3 }
  0x30   : > { %497 = vst.msk [vmem:[#allocation2 + $0x39] sm:$0xff] %vm445_vm0, %v480_v4 }
  0x31   : > { %498 = vst.msk [vmem:[#allocation2 + $0x49] sm:$0xff] %vm445_vm0, %v481_v5 }
  0x32   : > { %499 = vst.msk [vmem:[#allocation2 + $0x51] sm:$0xff] %vm445_vm0, %v482_v6 }
  0x33   : > { %500 = vst.msk [vmem:[#allocation2 + $0x61] sm:$0xff] %vm445_vm0, %v483_v7 }
  0x34   : > { %501 = vst.msk [vmem:[#allocation2 + $0x69] sm:$0xff] %vm445_vm0, %v484_v8 }
  0x35   : > { %502 = vst.msk [vmem:[#allocation2 + $0x79] sm:$0xff] %vm445_vm0, %v485_v9 }
  0x36   : > { %503 = vst.msk [vmem:[#allocation2 + $0x81] sm:$0xff] %vm445_vm0, %v486_v10 }
  0x37   : > { %504 = vst.msk [vmem:[#allocation2 + $0x91] sm:$0xff] %vm445_vm0, %v487_v11 }
  0x38   : > { %505 = vst.msk [vmem:[#allocation2 + $0x99] sm:$0xff] %vm445_vm0, %v488_v12  ;;  %513 = sbr.rel (%p1748_p11) target bundleno = 64 (0x40), region = 52 }
  0x39   : > { %506 = vst.msk [vmem:[#allocation2 + $0xa9] sm:$0xff] %vm445_vm0, %v489_v13 }
  0x3a   : > { %507 = vst.msk [vmem:[#allocation2 + $0xb1] sm:$0xff] %vm445_vm0, %v490_v14 }
  0x3b   : > { %508 = vst.msk [vmem:[#allocation2 + $0xc1] sm:$0xff] %vm445_vm0, %v491_v15 }
  0x3c   : > { %509 = vst.msk [vmem:[#allocation2 + $0xc9] sm:$0xff] %vm445_vm0, %v492_v16 }
  0x3d   : > { %v514_v17 = vld [vmem:[%s1989_s25] sm:$0xff]  ;;  %v515_v18 = vld [vmem:[%s1989_s25 + $0x8] sm:$0xff] }
  0x3e   : > { %516 = vst.msk [vmem:[#allocation2 + $0x1] sm:$0xff] %vm445_vm0, %v514_v17 }
  0x3f   : > { %517 = vst.msk [vmem:[#allocation2 + $0x9] sm:$0xff] %vm445_vm0, %v515_v18 }
  0x40 PF: > { %p1749_p12 = scmp.ge.s32.totalorder %s1842_s24, 1 }
  0x42   : > { %521 = sbr.rel (%p1749_p12) target bundleno = 74 (0x4a), region = 56 }
  0x47   : > { %v522_v19 = vld [vmem:[%s1996_s12] sm:$0xff]  ;;  %v523_v20 = vld [vmem:[%s1996_s12 + $0x8] sm:$0xff] }
  0x48   : > { %525 = vst.msk [vmem:[#allocation2 + $0xd9] sm:$0xff] %vm445_vm0, %v522_v19 }
  0x49   : > { %526 = vst.msk [vmem:[#allocation2 + $0xe1] sm:$0xff] %vm445_vm0, %v523_v20 }
  0x4a PF: > { %v1423_v21 = vld [vmem:[%s3077_s5] sm:$0xf]  ;;  %vm1476_vm2 = vcmask 1043456   ;;  %v2085_v23 = vld [vmem:[#allocation2 + $0x68] sm:$0xff]  ;;  %v2087_v24 = vld [vmem:[#allocation2 + $0x78] sm:$0xff]  ;;  %vm708_vm3 = vcmask 1046528  }
  0x4b   : > { %1772 = vmatpush.msk.msra.mxu2 %vm1476_vm2, %v1423_v21  ;;  %1773 = vmatpush.msk.msra.mxu3 %vm1476_vm2, %v1423_v21  ;;  %v2083_v22 = vld [vmem:[#allocation2 + $0x60] sm:$0xff]  ;;  %3161 = vst [vmem:[#allocation4_spill] sm:$0xff] %v2087_v24  ;;  %vm1072_vm4 = vcmask 1045504   ;;  %v559_v28 = vld [vmem:[%s3075_s3 + $0x8] sm:$0x7]  ;;  %v2116_v37 = vld [vmem:[#allocation2 + $0x90] sm:$0xff] }
  0x4c   : > { %3160 = vst [vmem:[#allocation3_spill] sm:$0xff] %v2083_v22  ;;  %v2089_v25 = vld [vmem:[#allocation2 + $0x80] sm:$0xff]  ;;  %1750 = vmatpush.msk.msra.mxu0 %vm1476_vm2, %v1423_v21  ;;  %1771 = vmatpush.msk.msra.mxu1 %vm1476_vm2, %v1423_v21  ;;  %v2108_v33 = vperm.slane %v559_v28, 0  ;;  %v2110_v34 = vperm.slane %v559_v28, 1  ;;  %v2128_v42 = vld [vmem:[#allocation2 + $0x98] sm:$0xff]  ;;  %v2156_v59 = vld [vmem:[#allocation2 + $0xa8] sm:$0xff] }
  0x4d   : > { %3162 = vst [vmem:[#allocation5_spill] sm:$0xff] %v2089_v25  ;;  %v557_v26 = vld [vmem:[%s3075_s3] sm:$0x7]  ;;  %v558_v27 = vld [vmem:[%s3075_s3 + $0x4] sm:$0x7]  ;;  %v2171_v3 = vperm.slane %v559_v28, 2 }
  0x4e   : > { %v2100_v29 = vperm.slane %v557_v26, 0  ;;  %v2102_v30 = vperm.slane %v558_v27, 0  ;;  %v2104_v31 = vperm.slane %v557_v26, 1  ;;  %v2106_v32 = vperm.slane %v558_v27, 1  ;;  %3163 = vst [vmem:[#allocation6_spill] sm:$0xff] %v2116_v37  ;;  %v2173_v4 = vld [vmem:[#allocation2 + $0xc0] sm:$0xff] }
  0x4f   : > { %v2112_v35 = vperm.slane %v557_v26, 2  ;;  %v2114_v36 = vperm.slane %v558_v27, 2  ;;  %v635_v43 = vmul.f32 %v2108_v33, %v2116_v37  ;;  %v915_v46 = vmul.f32 %v2110_v34, %v2116_v37  ;;  %3164 = vst [vmem:[#allocation7_spill] sm:$0xff] %v2156_v59  ;;  %v2189_v13 = vld [vmem:[#allocation2 + $0xb0] sm:$0xff]  ;;  %v2199_v21 = vld [vmem:[#allocation2 + $0xc8] sm:$0xff] }
  0x50   : > { %v569_v38 = vmul.f32 %v2100_v29, %v2083_v22  ;;  %v602_v39 = vmul.f32 %v2102_v30, %v2087_v24  ;;  %v672_v40 = vmul.f32 %v2104_v31, %v2083_v22  ;;  %v2126_v41 = vmul.f32 %v2104_v31, %v2085_v23  ;;  %3165 = vst [vmem:[#allocation8_spill] sm:$0xff] %v2173_v4 }
  0x51   : > { %v794_v44 = vmul.f32 %v2106_v32, %v2087_v24  ;;  %v2136_v45 = vmul.f32 %v2106_v32, %v2089_v25  ;;  %v2143_v50 = vmul.f32 %v2110_v34, %v2128_v42  ;;  %v971_v53 = vrot.slane %v915_v46, 1 }
  0x52   : > { %v618_v47 = vadd.f32 %v602_v39, %v569_v38  ;;  %v729_v48 = vrot.slane %v672_v40, 1  ;;  %v3095_v49 = vrot.slane %v2126_v41, 1  ;;  %v1036_v54 = vmul.f32 %v2112_v35, %v2083_v22 }
  0x53   : > { %v850_v51 = vrot.slane %v794_v44, 1  ;;  %v3094_v52 = vrot.slane %v2136_v45, 1  ;;  %v3093_v57 = vrot.slane %v2143_v50, 1  ;;  %v2154_v58 = vmul.f32 %v2112_v35, %v2085_v23 }
  0x54   : > { %v651_v55 = vadd.f32 %v635_v43, %v618_v47  ;;  %v731_v56 = vsel %vm708_vm3, %v729_v48, %v3095_v49  ;;  %v1093_v61 = vrot.slane %v1036_v54, 2  ;;  %v1158_v62 = vmul.f32 %v2114_v36, %v2087_v24 }
  0x55   : > { %v852_v60 = vsel %vm708_vm3, %v850_v51, %v3094_v52  ;;  %v2165_v63 = vmul.f32 %v2114_v36, %v2089_v25  ;;  %v973_v1 = vsel %vm708_vm3, %v971_v53, %v3093_v57  ;;  %v3091_v2 = vrot.slane %v2154_v58, 2 }
  0x56   : > { %v773_v0 = vadd.f32 %v731_v56, %v651_v55  ;;  %v1214_v5 = vrot.slane %v1158_v62, 2  ;;  %v573_v7 = vmul.f32 %v2100_v29, %v2116_v37  ;;  %v606_v8 = vmul.f32 %v2102_v30, %v2156_v59  ;;  %v2227_v55 = vld [vmem:[%s3076_s4] ss:$0 sm:$0xff] }
  0x57   : > { %v3090_v6 = vrot.slane %v2165_v63, 2  ;;  %v1095_v10 = vsel %vm1072_vm4, %v1093_v61, %v3091_v2  ;;  %v1279_v11 = vmul.f32 %v2171_v3, %v2116_v37  ;;  %v2187_v12 = vmul.f32 %v2171_v3, %v2128_v42 }
  0x58   : > { %v894_v9 = vadd.f32 %v852_v60, %v773_v0  ;;  %v622_v15 = vadd.f32 %v606_v8, %v573_v7  ;;  %v639_v16 = vmul.f32 %v2108_v33, %v2173_v4  ;;  %v678_v17 = vmul.f32 %v2104_v31, %v2116_v37 }
  0x59   : > { %v1216_v14 = vsel %vm1072_vm4, %v1214_v5, %v3090_v6  ;;  %v1335_v19 = vrot.slane %v1279_v11, 2  ;;  %v3086_v20 = vrot.slane %v2187_v12, 2  ;;  %v2203_v26 = vmul.f32 %v2104_v31, %v2128_v42  ;;  %v527_v11 = vld [vmem:[#allocation2] sm:$0xff] }
  0x5a   : > { %v1015_v18 = vadd.f32 %v973_v1, %v894_v9  ;;  %v655_v27 = vadd.f32 %v639_v16, %v622_v15  ;;  %v739_v28 = vrot.slane %v678_v17, 1  ;;  %v800_v38 = vmul.f32 %v2106_v32, %v2156_v59 }
  0x5b   : > { %v2209_v39 = vmul.f32 %v2106_v32, %v2189_v13  ;;  %v1337_v43 = vsel %vm1072_vm4, %v1335_v19, %v3086_v20  ;;  %v3085_v44 = vrot.slane %v2203_v26, 1  ;;  %v921_v46 = vmul.f32 %v2110_v34, %v2173_v4 }
  0x5c   : > { %v1137_v40 = vadd.f32 %v1095_v10, %v1015_v18  ;;  %v860_v47 = vrot.slane %v800_v38, 1  ;;  %v2220_v51 = vmul.f32 %v2110_v34, %v2199_v21  ;;  %v1042_v53 = vmul.f32 %v2112_v35, %v2116_v37  ;;  %v2256_v18 = vld [vmem:[#allocation2 + $0x18] sm:$0xff] }
  0x5d   : > { %v3084_v48 = vrot.slane %v2209_v39, 1  ;;  %v741_v56 = vsel %vm708_vm3, %v739_v28, %v3085_v44  ;;  %v981_v60 = vrot.slane %v921_v46, 1  ;;  %v2234_v61 = vmul.f32 %v2112_v35, %v2128_v42  ;;  %3166 = vst [vmem:[#allocation9_spill] sm:$0xff] %v2256_v18 }
  0x5e   : > { %v1258_v54 = vadd.f32 %v1216_v14, %v1137_v40  ;;  %v777_v62 = vadd.f32 %v741_v56, %v655_v27  ;;  %v3083_v1 = vrot.slane %v2220_v51, 1  ;;  %v1103_v5 = vrot.slane %v1042_v53, 2  ;;  %v2264_v53 = vld [vmem:[#allocation2 + $0x20] sm:$0xff] }
  0x5f   : > { %v862_v0 = vsel %vm708_vm3, %v860_v47, %v3084_v48  ;;  %v3082_v8 = vrot.slane %v2234_v61, 2  ;;  %v1164_v9 = vmul.f32 %v2114_v36, %v2156_v59  ;;  %v2245_v10 = vmul.f32 %v2114_v36, %v2189_v13  ;;  %v528_v47 = vld [vmem:[#allocation2 + $0x8] sm:$0xff] }
  0x60   : > { %v1379_v7 = vadd.f32 %v1337_v43, %v1258_v54  ;;  %v898_v14 = vadd.f32 %v862_v0, %v777_v62  ;;  %v983_v15 = vsel %vm708_vm3, %v981_v60, %v3083_v1  ;;  %v1285_v16 = vmul.f32 %v2171_v3, %v2173_v4  ;;  %v2270_v62 = vld [vmem:[#allocation2 + $0x30] sm:$0xff] }
  0x61   : > { %v2254_v17 = vmul.f32 %v2171_v3, %v2199_v21  ;;  %v1105_v27 = vsel %vm1072_vm4, %v1103_v5, %v3082_v8  ;;  %v1224_v28 = vrot.slane %v1164_v9, 2  ;;  %v3081_v38 = vrot.slane %v2245_v10, 2  ;;  %3167 = vst [vmem:[#allocation10_spill] sm:$0xff] %v2270_v62 }
  0x62   : > { %v1399_v19 = vadd.f32 %v2227_v55, %v1379_v7  ;;  %v1019_v40 = vadd.f32 %v983_v15, %v898_v14  ;;  %v1345_v43 = vrot.slane %v1285_v16, 2  ;;  %v561_v54 = vmul.f32 %v2100_v29, %v527_v11  ;;  %v2284_v16 = vld [vmem:[#allocation2 + $0x38] sm:$0xff] }
  0x63   : > { %v3080_v46 = vrot.slane %v2254_v17, 2  ;;  %v1226_v60 = vsel %vm1072_vm4, %v1224_v28, %v3081_v38  ;;  %v2273_v0 = vmul.f32 %v2100_v29, %v528_v47  ;;  %v594_v5 = vmul.f32 %v2102_v30, %v2256_v18 }
  0x64   : > { %v1415_v56 = vmax.f32 %v1399_v19, 0.0  ;;  %v1141_v7 = vadd.f32 %v1105_v27, %v1019_v40  ;;  %v627_v14 = vmul.f32 %v2108_v33, %v2270_v62  ;;  %v660_v15 = vmul.f32 %v2104_v31, %v527_v11 }
  0x65   : > { %v1347_v9 = vsel %vm1072_vm4, %v1345_v43, %v3080_v46  ;;  %v610_v19 = vadd.f32 %v594_v5, %v561_v54  ;;  %v2287_v28 = vmul.f32 %v2104_v31, %v528_v47  ;;  %v782_v27 = vmul.f32 %v2106_v32, %v2256_v18 }
  0x66   : > { %1759 = vmatmul.msk.f32.vlgmr.msra.gmra.mxu2 %vm445_vm0, %v1415_v56  ;;  %v2293_v40 = vmul.f32 %v2106_v32, %v2264_v53  ;;  %v1262_v43 = vadd.f32 %v1226_v60, %v1141_v7  ;;  %v709_v46 = vrot.slane %v660_v15, 1  ;;  %v903_v38 = vmul.f32 %v2110_v34, %v2270_v62 }
  0x67   : > { %v2299_v56 = vmul.f32 %v2110_v34, %v2284_v16  ;;  %v643_v54 = vadd.f32 %v627_v14, %v610_v19  ;;  %v3088_v5 = vrot.slane %v2287_v28, 1  ;;  %v830_v8 = vrot.slane %v782_v27, 1 }
  0x68   : > { %v3087_v1 = vrot.slane %v2293_v40, 1  ;;  %v1383_v48 = vadd.f32 %v1347_v9, %v1262_v43  ;;  %v951_v44 = vrot.slane %v903_v38, 1  ;;  %v1024_v60 = vmul.f32 %v2112_v35, %v527_v11  ;;  %v2320_v43 = vld [vmem:[#allocation2 + $0x48] sm:$0xff] }
  0x69   : > { %v3089_v20 = vrot.slane %v2299_v56, 1  ;;  %v711_v7 = vsel %vm708_vm3, %v709_v46, %v3088_v5  ;;  %v2312_v14 = vmul.f32 %v2112_v35, %v528_v47  ;;  %v1146_v19 = vmul.f32 %v2114_v36, %v2256_v18  ;;  %3168 = vst [vmem:[#allocation11_spill] sm:$0xff] %v2320_v43 }
  0x6a   : > { %v832_v15 = vsel %vm708_vm3, %v830_v8, %v3087_v1  ;;  %v1403_v38 = vadd.f32 %v2227_v55, %v1383_v48  ;;  %v765_v9 = vadd.f32 %v711_v7, %v643_v54  ;;  %v1073_v27 = vrot.slane %v1024_v60, 2 }
  0x6b   : > { %v953_v11 = vsel %vm708_vm3, %v951_v44, %v3089_v20  ;;  %v3092_v46 = vrot.slane %v2312_v14, 2  ;;  %v2325_v8 = vmul.f32 %v2114_v36, %v2264_v53  ;;  %v1194_v47 = vrot.slane %v1146_v19, 2  ;;  %v2339_v19 = vld [vmem:[#allocation2 + $0x50] sm:$0xff] }
  0x6c   : > { %v1267_v1 = vmul.f32 %v2171_v3, %v2270_v62  ;;  %v1419_v5 = vmax.f32 %v1403_v38, 0.0  ;;  %v886_v48 = vadd.f32 %v832_v15, %v765_v9  ;;  %v2331_v54 = vmul.f32 %v2171_v3, %v2284_v16 }
  0x6d   : > { %v565_v44 = vmul.f32 %v2100_v29, %v2270_v62  ;;  %v1075_v60 = vsel %vm1072_vm4, %v1073_v27, %v3092_v46  ;;  %v3096_v7 = vrot.slane %v2325_v8, 2  ;;  %v598_v38 = vmul.f32 %v2102_v30, %v2320_v43 }
  0x6e   : > { %v1315_v20 = vrot.slane %v1267_v1, 2  ;;  %1763 = vmatmul.msk.f32.vlgmr.msra.gmra.mxu3 %vm445_vm0, %v1419_v5  ;;  %v1007_v15 = vadd.f32 %v953_v11, %v886_v48  ;;  %v3099_v9 = vrot.slane %v2331_v54, 2  ;;  %v631_v6 = vmul.f32 %v2108_v33, %v2083_v22 }
  0x6f   : > { %v666_v2 = vmul.f32 %v2104_v31, %v2270_v62  ;;  %v1196_v1 = vsel %vm1072_vm4, %v1194_v47, %v3096_v7  ;;  %v614_v27 = vadd.f32 %v598_v38, %v565_v44  ;;  %v2354_v46 = vmul.f32 %v2104_v31, %v2284_v16 }
  0x70   : > { %v788_v5 = vmul.f32 %v2106_v32, %v2320_v43  ;;  %v1129_v11 = vadd.f32 %v1075_v60, %v1007_v15  ;;  %v1317_v48 = vsel %vm1072_vm4, %v1315_v20, %v3099_v9  ;;  %v2363_v52 = vmul.f32 %v2106_v32, %v2339_v19 }
  0x71   : > { %v719_v57 = vrot.slane %v666_v2, 1  ;;  %v647_v49 = vadd.f32 %v631_v6, %v614_v27  ;;  %v3104_v47 = vrot.slane %v2354_v46, 1  ;;  %v909_v38 = vmul.f32 %v2110_v34, %v2083_v22 }
  0x72   : > { %v840_v44 = vrot.slane %v788_v5, 1  ;;  %v1250_v7 = vadd.f32 %v1196_v1, %v1129_v11  ;;  %v3109_v18 = vrot.slane %v2363_v52, 1  ;;  %v2371_v60 = vmul.f32 %v2110_v34, %v2085_v23 }
  0x73   : > { %v1030_v2 = vmul.f32 %v2112_v35, %v2270_v62  ;;  %v721_v6 = vsel %vm708_vm3, %v719_v57, %v3104_v47  ;;  %v961_v20 = vrot.slane %v909_v38, 1  ;;  %v2380_v15 = vmul.f32 %v2112_v35, %v2284_v16 }
  0x74   : > { %3169 = vst [vmem:[#allocation12_spill] sm:$0xff] %v2371_v60  ;;  %v1152_v1 = vmul.f32 %v2114_v36, %v2320_v43  ;;  %v1371_v27 = vadd.f32 %v1317_v48, %v1250_v7  ;;  %v769_v5 = vadd.f32 %v721_v6, %v647_v49  ;;  %v842_v11 = vsel %vm708_vm3, %v840_v44, %v3109_v18  ;;  %v2399_v48 = vld [vmem:[#allocation2 + $0x70] sm:$0x3]  ;;  %v2419_v18 = vld [vmem:[#allocation2 + $0xa0] sm:$0x3] }
  0x75   : > { %3170 = vst [vmem:[#allocation13_spill] sm:$0xff] %v2380_v15  ;;  %v3107_v9 = vrot.slane %v2371_v60, 1  ;;  %v1083_v62 = vrot.slane %v1030_v2, 2  ;;  %v3108_v4 = vrot.slane %v2380_v15, 2  ;;  %v2391_v57 = vmul.f32 %v2114_v36, %v2339_v19 }
  0x76   : > { %v1204_v38 = vrot.slane %v1152_v1, 2  ;;  %v1391_v47 = vadd.f32 %v2227_v55, %v1371_v27  ;;  %v890_v59 = vadd.f32 %v842_v11, %v769_v5  ;;  %v1273_v7 = vmul.f32 %v2171_v3, %v2083_v22  ;;  %3172 = vst [vmem:[#allocation15_spill] sm:$0xff] %v2399_v48  ;;  %v2409_v1 = vld [vmem:[#allocation2 + $0x88] sm:$0x3] }
  0x77   : > { %3171 = vst [vmem:[#allocation14_spill] sm:$0xff] %v2391_v57  ;;  %v963_v49 = vsel %vm708_vm3, %v961_v20, %v3107_v9  ;;  %v1085_v44 = vsel %vm1072_vm4, %v1083_v62, %v3108_v4  ;;  %v3114_v2 = vrot.slane %v2391_v57, 2  ;;  %v2407_v6 = vmul.f32 %v2171_v3, %v2085_v23 }
  0x78   : > { %v570_v20 = vmul.f32 %v2100_v29, %v2085_v23  ;;  %v1407_v27 = vmax.f32 %v1391_v47, 0.0  ;;  %v1011_v5 = vadd.f32 %v963_v49, %v890_v59  ;;  %v1325_v11 = vrot.slane %v1273_v7, 2 }
  0x79   : > { %3173 = vst [vmem:[#allocation16_spill] sm:$0xff] %v2407_v6  ;;  %v603_v9 = vmul.f32 %v2102_v30, %v2089_v25  ;;  %v1206_v62 = vsel %vm1072_vm4, %v1204_v38, %v3114_v2  ;;  %v3123_v4 = vrot.slane %v2407_v6, 2  ;;  %v636_v22 = vmul.f32 %v2108_v33, %v2128_v42 }
  0x7a   : > { %v674_v43 = vmul.f32 %v2104_v31, %v2399_v48  ;;  %1751 = vmatmul.msk.f32.vlgmr.msra.gmra.mxu0 %vm445_vm0, %v1407_v27  ;;  %v1133_v59 = vadd.f32 %v1085_v44, %v1011_v5  ;;  %v796_v49 = vmul.f32 %v2106_v32, %v2409_v1  ;;  %v917_v38 = vmul.f32 %v2110_v34, %v2419_v18 }
  0x7b   : > { %v619_v47 = vadd.f32 %v603_v9, %v570_v20  ;;  %v1327_v7 = vsel %vm1072_vm4, %v1325_v11, %v3123_v4  ;;  %v1038_v25 = vmul.f32 %v2112_v35, %v2399_v48  ;;  %v1160_v57 = vmul.f32 %v2114_v36, %v2409_v1 }
  0x7c   : > { %v732_v2 = vrot.slane %v674_v43, 1  ;;  %v1254_v27 = vadd.f32 %v1206_v62, %v1133_v59  ;;  %v853_v9 = vrot.slane %v796_v49, 1  ;;  %v974_v20 = vrot.slane %v917_v38, 1  ;;  %v2448_v59 = vld [vmem:[#allocation2 + $0xb8] sm:$0x3] }
  0x7d   : > { %v652_v44 = vadd.f32 %v636_v22, %v619_v47  ;;  %v3174_v5 = vrot.slane %v2126_v41, 1  ;;  %v1096_v24 = vrot.slane %v1038_v25, 2  ;;  %v1217_v15 = vrot.slane %v1160_v57, 2  ;;  %v2450_v41 = vld [vmem:[#allocation2 + $0xd0] sm:$0x3] }
  0x7e   : > { %v1281_v11 = vmul.f32 %v2171_v3, %v2419_v18  ;;  %v1375_v43 = vadd.f32 %v1327_v7, %v1254_v27  ;;  %v3175_v6 = vrot.slane %v2136_v45, 1  ;;  %v3176_v62 = vrot.slane %v2143_v50, 1 }
  0x7f   : > { %v733_v37 = vsel %vm708_vm3, %v3174_v5, %v732_v2  ;;  %v3177_v25 = vrot.slane %v2154_v58, 2  ;;  %v3178_v2 = vrot.slane %v2165_v63, 2  ;;  %v574_v45 = vmul.f32 %v2100_v29, %v2128_v42 }
  0x80   : > { %v774_v4 = vadd.f32 %v733_v37, %v652_v44  ;;  %v854_v60 = vsel %vm708_vm3, %v3175_v6, %v853_v9  ;;  %v975_v22 = vsel %vm708_vm3, %v3176_v62, %v974_v20  ;;  %v1338_v47 = vrot.slane %v1281_v11, 2 }
  0x81   : > { %v1097_v57 = vsel %vm1072_vm4, %v3177_v25, %v1096_v24  ;;  %v1218_v37 = vsel %vm1072_vm4, %v3178_v2, %v1217_v15  ;;  %v1395_v50 = vadd.f32 %v2227_v55, %v1375_v43  ;;  %v607_v49 = vmul.f32 %v2102_v30, %v2189_v13  ;;  %v529_v2 = vld [vmem:[#allocation2 + $0x10] sm:$0x3] }
  0x82   : > { %v895_v6 = vadd.f32 %v854_v60, %v774_v4  ;;  %v640_v38 = vmul.f32 %v2108_v33, %v2199_v21  ;;  %v3179_v58 = vrot.slane %v2187_v12, 2  ;;  %v680_v63 = vmul.f32 %v2104_v31, %v2419_v18 }
  0x83   : > { %v802_v15 = vmul.f32 %v2106_v32, %v2448_v59  ;;  %v923_v7 = vmul.f32 %v2110_v34, %v2450_v41  ;;  %v1411_v4 = vmax.f32 %v1395_v50, 0.0  ;;  %v623_v27 = vadd.f32 %v607_v49, %v574_v45 }
  0x84   : > { %v1339_v24 = vsel %vm1072_vm4, %v3179_v58, %v1338_v47  ;;  %v1016_v60 = vadd.f32 %v975_v22, %v895_v6  ;;  %v1044_v44 = vmul.f32 %v2112_v35, %v2419_v18  ;;  %v742_v9 = vrot.slane %v680_v63, 1 }
  0x85   : > { %v863_v20 = vrot.slane %v802_v15, 1  ;;  %v984_v12 = vrot.slane %v923_v7, 1  ;;  %v1166_v5 = vmul.f32 %v2114_v36, %v2448_v59  ;;  %1755 = vmatmul.msk.f32.vlgmr.msra.gmra.mxu1 %vm445_vm0, %v1411_v4  ;;  %v656_v43 = vadd.f32 %v640_v38, %v623_v27 }
  0x86   : > { %v1138_v11 = vadd.f32 %v1097_v57, %v1016_v60  ;;  %v1106_v62 = vrot.slane %v1044_v44, 2  ;;  %v1287_v25 = vmul.f32 %v2171_v3, %v2450_v41  ;;  %v3180_v22 = vrot.slane %v2203_v26, 1  ;;  %v2490_v57 = vld [vmem:[#allocation2 + $0x28] sm:$0x3] }
  0x87   : > { %v3181_v45 = vrot.slane %v2209_v39, 1  ;;  %v3182_v6 = vrot.slane %v2220_v51, 1  ;;  %v1227_v58 = vrot.slane %v1166_v5, 2  ;;  %v3183_v15 = vrot.slane %v2234_v61, 2 }
  0x88   : > { %v743_v47 = vsel %vm708_vm3, %v3180_v22, %v742_v9  ;;  %v1259_v38 = vadd.f32 %v1218_v37, %v1138_v11  ;;  %v1348_v26 = vrot.slane %v1287_v25, 2  ;;  %v3184_v4 = vrot.slane %v2245_v10, 2 }
  0x89   : > { %v864_v50 = vsel %vm708_vm3, %v3181_v45, %v863_v20  ;;  %v985_v49 = vsel %vm708_vm3, %v3182_v6, %v984_v12  ;;  %v778_v63 = vadd.f32 %v743_v47, %v656_v43  ;;  %v1107_v7 = vsel %vm1072_vm4, %v3183_v15, %v1106_v62  ;;  %v2506_v20 = vld [vmem:[#allocation2 + $0x40] sm:$0x3] }
  0x8a   : > { %v1228_v39 = vsel %vm1072_vm4, %v3184_v4, %v1227_v58  ;;  %v595_v60 = vmul.f32 %v2102_v30, %v2264_v53  ;;  %v628_v51 = vmul.f32 %v2108_v33, %v2284_v16  ;;  %v662_v27 = vmul.f32 %v2104_v31, %v529_v2 }
  0x8b   : > { %v1380_v44 = vadd.f32 %v1339_v24, %v1259_v38  ;;  %v899_v37 = vadd.f32 %v864_v50, %v778_v63  ;;  %v3185_v9 = vrot.slane %v2254_v17, 2  ;;  %v784_v10 = vmul.f32 %v2106_v32, %v2490_v57 }
  0x8c   : > { %v611_v12 = vadd.f32 %v595_v60, %v2273_v0  ;;  %v712_v5 = vrot.slane %v662_v27, 1  ;;  %v905_v11 = vmul.f32 %v2110_v34, %v2506_v20  ;;  %v1026_v43 = vmul.f32 %v2112_v35, %v529_v2 }
  0x8d   : > { %v1349_v61 = vsel %vm1072_vm4, %v3185_v9, %v1348_v26  ;;  %v1400_v24 = vadd.f32 %v2227_v55, %v1380_v44  ;;  %v1020_v62 = vadd.f32 %v985_v49, %v899_v37  ;;  %v833_v25 = vrot.slane %v784_v10, 1 }
  0x8e   : > { %v1148_v17 = vmul.f32 %v2114_v36, %v2490_v57  ;;  %v644_v22 = vadd.f32 %v628_v51, %v611_v12  ;;  %v3186_v47 = vrot.slane %v2287_v28, 1  ;;  %v954_v50 = vrot.slane %v905_v11, 1  ;;  %v2531_v51 = vld [vmem:[#allocation2 + $0x58] sm:$0x3] }
  0x8f   : > { %v1076_v0 = vrot.slane %v1026_v43, 2  ;;  %v1416_v6 = vmax.f32 %v1400_v24, 0.0  ;;  %v1142_v58 = vadd.f32 %v1107_v7, %v1020_v62  ;;  %v3187_v38 = vrot.slane %v2293_v40, 1 }
  0x90   : > { %v713_v45 = vsel %vm708_vm3, %v3186_v47, %v712_v5  ;;  %v1197_v63 = vrot.slane %v1148_v17, 2  ;;  %v3188_v49 = vrot.slane %v2299_v56, 1  ;;  %v3189_v4 = vrot.slane %v2312_v14, 2 }
  0x91   : > { %v834_v2 = vsel %vm708_vm3, %v3187_v38, %v833_v25  ;;  %v766_v15 = vadd.f32 %v713_v45, %v644_v22  ;;  %v1269_v60 = vmul.f32 %v2171_v3, %v2506_v20  ;;  %1760 = vmatmul.msk.f32.gmra.mxu2 %vm445_vm0, %v1416_v6  ;;  %v1263_v40 = vadd.f32 %v1228_v39, %v1142_v58 }
  0x92   : > { %v955_v26 = vsel %vm708_vm3, %v3188_v49, %v954_v50  ;;  %v1077_v28 = vsel %vm1072_vm4, %v3189_v4, %v1076_v0  ;;  %v3190_v7 = vrot.slane %v2325_v8, 2  ;;  %v566_v56 = vmul.f32 %v2100_v29, %v2284_v16 }
  0x93   : > { %v599_v14 = vmul.f32 %v2102_v30, %v2339_v19  ;;  %v887_v44 = vadd.f32 %v834_v2, %v766_v15  ;;  %v1318_v37 = vrot.slane %v1269_v60, 2  ;;  %v632_v9 = vmul.f32 %v2108_v33, %v2085_v23  ;;  %v3194_v15 = vld [vmem:[#allocation12_spill] sm:$0xff] }
  0x94   : > { %v1198_v27 = vsel %vm1072_vm4, %v3190_v7, %v1197_v63  ;;  %v668_v10 = vmul.f32 %v2104_v31, %v2506_v20  ;;  %v1384_v12 = vadd.f32 %v1349_v61, %v1263_v40  ;;  %v790_v8 = vmul.f32 %v2106_v32, %v2531_v51 }
  0x95   : > { %v615_v39 = vadd.f32 %v599_v14, %v566_v56  ;;  %v911_v5 = vmul.f32 %v2110_v34, %v2399_v48  ;;  %v1008_v11 = vadd.f32 %v955_v26, %v887_v44  ;;  %v3191_v43 = vrot.slane %v2331_v54, 2  ;;  %v3198_v14 = vld [vmem:[#allocation4_spill] sm:$0xff]  ;;  %v3199_v44 = vld [vmem:[#allocation6_spill] sm:$0xff] }
  0x96   : > { %v722_v62 = vrot.slane %v668_v10, 1  ;;  %v1032_v25 = vmul.f32 %v2112_v35, %v2506_v20  ;;  %v1404_v17 = vadd.f32 %v2227_v55, %v1384_v12  ;;  %v843_v61 = vrot.slane %v790_v8, 1  ;;  %v3201_v12 = vld [vmem:[#allocation14_spill] sm:$0xff] }
  0x97   : > { %v1319_v24 = vsel %vm1072_vm4, %v3191_v43, %v1318_v37  ;;  %v648_v22 = vadd.f32 %v632_v9, %v615_v39  ;;  %v964_v47 = vrot.slane %v911_v5, 1  ;;  %v1130_v45 = vadd.f32 %v1077_v28, %v1008_v11  ;;  %v3196_v28 = vld [vmem:[#allocation13_spill] sm:$0xff]  ;;  %v3200_v9 = vld [vmem:[#allocation7_spill] sm:$0xff] }
  0x98   : > { %v3192_v50 = vrot.slane %v2354_v46, 1  ;;  %v1086_v6 = vrot.slane %v1032_v25, 2  ;;  %v1154_v54 = vmul.f32 %v2114_v36, %v2531_v51  ;;  %v1420_v58 = vmax.f32 %v1404_v17, 0.0  ;;  %v3203_v25 = vld [vmem:[#allocation5_spill] sm:$0xff] }
  0x99   : > { %v3193_v2 = vrot.slane %v2363_v52, 1  ;;  %v3195_v49 = vrot.slane %v3194_v15, 1  ;;  %v1251_v4 = vadd.f32 %v1198_v27, %v1130_v45  ;;  %v3197_v60 = vrot.slane %v3196_v28, 2 }
  0x9a   : > { %v723_v0 = vsel %vm708_vm3, %v3192_v50, %v722_v62  ;;  %v1207_v40 = vrot.slane %v1154_v54, 2  ;;  %v1275_v7 = vmul.f32 %v2171_v3, %v2399_v48  ;;  %1764 = vmatmul.msk.f32.gmra.mxu3 %vm445_vm0, %v1420_v58  ;;  %v571_v52 = vmul.f32 %v2100_v29, %v3198_v14 }
  0x9b   : > { %v770_v38 = vadd.f32 %v723_v0, %v648_v22  ;;  %v844_v63 = vsel %vm708_vm3, %v3193_v2, %v843_v61  ;;  %v965_v26 = vsel %vm708_vm3, %v3195_v49, %v964_v47  ;;  %v1087_v46 = vsel %vm1072_vm4, %v3197_v60, %v1086_v6 }
  0x9c   : > { %v604_v37 = vmul.f32 %v2102_v30, %v3199_v44  ;;  %v637_v27 = vmul.f32 %v2108_v33, %v3200_v9  ;;  %v1372_v10 = vadd.f32 %v1319_v24, %v1251_v4  ;;  %v3202_v39 = vrot.slane %v3201_v12, 2  ;;  %v3204_v24 = vld [vmem:[#allocation16_spill] sm:$0xff] }
  0x9d   : > { %v891_v56 = vadd.f32 %v844_v63, %v770_v38  ;;  %v1328_v5 = vrot.slane %v1275_v7, 2  ;;  %v675_v11 = vmul.f32 %v2104_v31, %v3198_v14  ;;  %v2585_v17 = vmul.f32 %v2104_v31, %v3203_v25 }
  0x9e   : > { %v1208_v8 = vsel %vm1072_vm4, %v3202_v39, %v1207_v40  ;;  %v620_v62 = vadd.f32 %v604_v37, %v571_v52  ;;  %v797_v22 = vmul.f32 %v2106_v32, %v3199_v44  ;;  %v1392_v61 = vadd.f32 %v2227_v55, %v1372_v10 }
  0x9f   : > { %v1012_v43 = vadd.f32 %v965_v26, %v891_v56  ;;  %v3205_v47 = vrot.slane %v3204_v24, 2  ;;  %v734_v50 = vrot.slane %v675_v11, 1  ;;  %v2595_v0 = vmul.f32 %v2106_v32, %v2128_v42  ;;  %v554_v11 = vld [vmem:[#allocation2 + $0xd8] sm:$0xff] }
  0xa0   : > { %v653_v54 = vadd.f32 %v637_v27, %v620_v62  ;;  %v3137_v58 = vrot.slane %v2585_v17, 1  ;;  %v855_v38 = vrot.slane %v797_v22, 1  ;;  %v1408_v2 = vmax.f32 %v1392_v61, 0.0 }
  0xa1   : > { %v1329_v45 = vsel %vm1072_vm4, %v3205_v47, %v1328_v5  ;;  %v1134_v6 = vadd.f32 %v1087_v46, %v1012_v43  ;;  %v3136_v63 = vrot.slane %v2595_v0, 1  ;;  %v918_v15 = vmul.f32 %v2110_v34, %v3200_v9 }
  0xa2   : > { %v2603_v49 = vmul.f32 %v2110_v34, %v2189_v13  ;;  %v736_v4 = vsel %vm708_vm3, %v734_v50, %v3137_v58  ;;  %v1039_v28 = vmul.f32 %v2112_v35, %v3198_v14  ;;  %v2612_v60 = vmul.f32 %v2112_v35, %v3203_v25  ;;  %1752 = vmatmul.msk.f32.gmra.mxu0 %vm445_vm0, %v1408_v2 }
  0xa3   : > { %v1255_v26 = vadd.f32 %v1208_v8, %v1134_v6  ;;  %v775_v46 = vadd.f32 %v736_v4, %v653_v54  ;;  %v857_v40 = vsel %vm708_vm3, %v855_v38, %v3136_v63  ;;  %v976_v7 = vrot.slane %v918_v15, 1  ;;  %v3206_v54 = vld [vmem:[#allocation8_spill] sm:$0xff]  ;;  %v2649_v4 = vld [vmem:[#allocation2 + $0xe0] sm:$0xff] }
  0xa4   : > { %v3135_v56 = vrot.slane %v2603_v49, 1  ;;  %v1098_v37 = vrot.slane %v1039_v28, 2  ;;  %v3133_v27 = vrot.slane %v2612_v60, 2  ;;  %v1161_v10 = vmul.f32 %v2114_v36, %v3199_v44 }
  0xa5   : > { %v1376_v52 = vadd.f32 %v1329_v45, %v1255_v26  ;;  %v896_v12 = vadd.f32 %v857_v40, %v775_v46  ;;  %v2627_v8 = vmul.f32 %v2114_v36, %v2128_v42  ;;  %v1282_v5 = vmul.f32 %v2171_v3, %v3200_v9 }
  0xa6   : > { %v978_v39 = vsel %vm708_vm3, %v976_v7, %v3135_v56  ;;  %v1100_v62 = vsel %vm1072_vm4, %v1098_v37, %v3133_v27  ;;  %v1219_v44 = vrot.slane %v1161_v10, 2  ;;  %v2637_v22 = vmul.f32 %v2171_v3, %v2189_v13 }
  0xa7   : > { %v1396_v43 = vadd.f32 %v2227_v55, %v1376_v52  ;;  %v1017_v61 = vadd.f32 %v978_v39, %v896_v12  ;;  %v3131_v24 = vrot.slane %v2627_v8, 2  ;;  %v1340_v47 = vrot.slane %v1282_v5, 2 }
  0xa8   : > { %v575_v45 = vmul.f32 %v2100_v29, %v3200_v9  ;;  %v3126_v6 = vrot.slane %v2637_v22, 2  ;;  %v608_v38 = vmul.f32 %v2102_v30, %v3206_v54  ;;  %v641_v2 = vmul.f32 %v2108_v33, %v554_v11 }
  0xa9   : > { %v1412_v50 = vmax.f32 %v1396_v43, 0.0  ;;  %v1139_v15 = vadd.f32 %v1100_v62, %v1017_v61  ;;  %v1221_v26 = vsel %vm1072_vm4, %v1219_v44, %v3131_v24  ;;  %v681_v28 = vmul.f32 %v2104_v31, %v3200_v9 }
  0xaa   : > { %v1342_v46 = vsel %vm1072_vm4, %v1340_v47, %v3126_v6  ;;  %v624_v40 = vadd.f32 %v608_v38, %v575_v45  ;;  %v2659_v7 = vmul.f32 %v2104_v31, %v2189_v13  ;;  %v803_v52 = vmul.f32 %v2106_v32, %v3206_v54 }
  0xab   : > { %1756 = vmatmul.msk.f32.gmra.mxu1 %vm445_vm0, %v1412_v50  ;;  %v1260_v37 = vadd.f32 %v1221_v26, %v1139_v15  ;;  %v744_v10 = vrot.slane %v681_v28, 1  ;;  %v2665_v12 = vmul.f32 %v2106_v32, %v2199_v21  ;;  %v924_v39 = vmul.f32 %v2110_v34, %v554_v11 }
  0xac   : > { %v657_v5 = vadd.f32 %v641_v2, %v624_v40  ;;  %v3130_v43 = vrot.slane %v2659_v7, 1  ;;  %v865_v62 = vrot.slane %v803_v52, 1  ;;  %v2671_v44 = vmul.f32 %v2110_v34, %v2649_v4 }
  0xad   : > { %v1381_v61 = vadd.f32 %v1342_v46, %v1260_v37  ;;  %v3128_v47 = vrot.slane %v2665_v12, 1  ;;  %v986_v45 = vrot.slane %v924_v39, 1  ;;  %v1045_v50 = vmul.f32 %v2112_v35, %v3200_v9 }
  0xae   : > { %v746_v38 = vsel %vm708_vm3, %v744_v10, %v3130_v43  ;;  %v3127_v2 = vrot.slane %v2671_v44, 1  ;;  %v2682_v15 = vmul.f32 %v2112_v35, %v2189_v13  ;;  %v1167_v26 = vmul.f32 %v2114_v36, %v3206_v54 }
  0xaf   : > { %v1401_v28 = vadd.f32 %v2227_v55, %v1381_v61  ;;  %v779_v46 = vadd.f32 %v746_v38, %v657_v5  ;;  %v867_v9 = vsel %vm708_vm3, %v865_v62, %v3128_v47  ;;  %v1108_v40 = vrot.slane %v1045_v50, 2  ;;  %v3207_v50 = vld [vmem:[#allocation9_spill] sm:$0xff] }
  0xb0   : > { %v988_v52 = vsel %vm708_vm3, %v986_v45, %v3127_v2  ;;  %v3129_v37 = vrot.slane %v2682_v15, 2  ;;  %v2696_v10 = vmul.f32 %v2114_v36, %v2199_v21  ;;  %v1229_v39 = vrot.slane %v1167_v26, 2  ;;  %v3208_v2 = vld [vmem:[#allocation10_spill] sm:$0xff] }
  0xb1   : > { %v1417_v54 = vmax.f32 %v1401_v28, 0.0  ;;  %v900_v6 = vadd.f32 %v867_v9, %v779_v46  ;;  %v1288_v5 = vmul.f32 %v2171_v3, %v554_v11  ;;  %v2701_v61 = vmul.f32 %v2171_v3, %v2649_v4  ;;  %v3209_v9 = vld [vmem:[#allocation11_spill] sm:$0xff] }
  0xb2   : > { %v1110_v62 = vsel %vm1072_vm4, %v1108_v40, %v3129_v37  ;;  %v3132_v45 = vrot.slane %v2696_v10, 2  ;;  %v563_v38 = vmul.f32 %v2100_v29, %v3207_v50  ;;  %v596_v26 = vmul.f32 %v2102_v30, %v3208_v2 }
  0xb3   : > { %1761 = vmatmul.msk.f32.gmra.mxu2 %vm445_vm0, %v1417_v54  ;;  %v1021_v28 = vadd.f32 %v988_v52, %v900_v6  ;;  %v1350_v11 = vrot.slane %v1288_v5, 2  ;;  %v3134_v46 = vrot.slane %v2701_v61, 2  ;;  %v629_v47 = vmul.f32 %v2108_v33, %v3209_v9 }
  0xb4   : > { %v1231_v40 = vsel %vm1072_vm4, %v1229_v39, %v3132_v45  ;;  %v612_v37 = vadd.f32 %v596_v26, %v563_v38  ;;  %v663_v43 = vmul.f32 %v2104_v31, %v3207_v50  ;;  %v2722_v24 = vmul.f32 %v2104_v31, %v2264_v53 }
  0xb5   : > { %v1143_v54 = vadd.f32 %v1110_v62, %v1021_v28  ;;  %v1352_v6 = vsel %vm1072_vm4, %v1350_v11, %v3134_v46  ;;  %v785_v52 = vmul.f32 %v2106_v32, %v3208_v2  ;;  %v2731_v5 = vmul.f32 %v2106_v32, %v2284_v16 }
  0xb6   : > { %v645_v39 = vadd.f32 %v629_v47, %v612_v37  ;;  %v714_v38 = vrot.slane %v663_v43, 1  ;;  %v3142_v26 = vrot.slane %v2722_v24, 1  ;;  %v906_v45 = vmul.f32 %v2110_v34, %v3209_v9 }
  0xb7   : > { %v1264_v27 = vadd.f32 %v1231_v40, %v1143_v54  ;;  %v835_v62 = vrot.slane %v785_v52, 1  ;;  %v3139_v28 = vrot.slane %v2731_v5, 1  ;;  %v2739_v11 = vmul.f32 %v2110_v34, %v2339_v19 }
  0xb8   : > { %v716_v46 = vsel %vm708_vm3, %v714_v38, %v3142_v26  ;;  %v956_v56 = vrot.slane %v906_v45, 1  ;;  %v1027_v43 = vmul.f32 %v2112_v35, %v3207_v50  ;;  %v2748_v47 = vmul.f32 %v2112_v35, %v2264_v53 }
  0xb9   : > { %3210 = vst [vmem:[#allocation12_spill] sm:$0xff] %v2739_v11  ;;  %v1385_v37 = vadd.f32 %v1352_v6, %v1264_v27  ;;  %v767_v40 = vadd.f32 %v716_v46, %v645_v39  ;;  %v837_v54 = vsel %vm708_vm3, %v835_v62, %v3139_v28  ;;  %v3138_v52 = vrot.slane %v2739_v11, 1 }
  0xba   : > { %3211 = vst [vmem:[#allocation13_spill] sm:$0xff] %v2748_v47  ;;  %v1078_v63 = vrot.slane %v1027_v43, 2  ;;  %v3140_v58 = vrot.slane %v2748_v47, 2  ;;  %v1149_v45 = vmul.f32 %v2114_v36, %v3208_v2  ;;  %v2759_v50 = vmul.f32 %v2114_v36, %v2284_v16 }
  0xbb   : > { %v1405_v38 = vadd.f32 %v2227_v55, %v1385_v37  ;;  %v888_v27 = vadd.f32 %v837_v54, %v767_v40  ;;  %v958_v46 = vsel %vm708_vm3, %v956_v56, %v3138_v52  ;;  %v1270_v6 = vmul.f32 %v2171_v3, %v3209_v9 }
  0xbc   : > { %3212 = vst [vmem:[#allocation4_spill] sm:$0xff] %v2759_v50  ;;  %v1080_v39 = vsel %vm1072_vm4, %v1078_v63, %v3140_v58  ;;  %v1199_v62 = vrot.slane %v1149_v45, 2  ;;  %v3141_v2 = vrot.slane %v2759_v50, 2  ;;  %v2773_v43 = vmul.f32 %v2171_v3, %v2339_v19  ;;  %v3214_v63 = vld [vmem:[#allocation3_spill] sm:$0xff] }
  0xbd   : > { %v1421_v37 = vmax.f32 %v1405_v38, 0.0  ;;  %v1009_v40 = vadd.f32 %v958_v46, %v888_v27  ;;  %v1320_v54 = vrot.slane %v1270_v6, 2  ;;  %v567_v56 = vmul.f32 %v2100_v29, %v3209_v9 }
  0xbe   : > { %3213 = vst [vmem:[#allocation6_spill] sm:$0xff] %v2773_v43  ;;  %v1201_v52 = vsel %vm1072_vm4, %v1199_v62, %v3141_v2  ;;  %v3153_v28 = vrot.slane %v2773_v43, 2  ;;  %v600_v45 = vmul.f32 %v2102_v30, %v3214_v63  ;;  %v633_v58 = vmul.f32 %v2108_v33, %v3198_v14 }
  0xbf   : > { %1765 = vmatmul.msk.f32.gmra.mxu3 %vm445_vm0, %v1421_v37  ;;  %v1131_v38 = vadd.f32 %v1080_v39, %v1009_v40  ;;  %v669_v27 = vmul.f32 %v2104_v31, %v3209_v9  ;;  %v2790_v46 = vmul.f32 %v2104_v31, %v2339_v19  ;;  %v791_v6 = vmul.f32 %v2106_v32, %v3214_v63 }
  0xc0   : > { %v1322_v62 = vsel %vm1072_vm4, %v1320_v54, %v3153_v28  ;;  %v616_v2 = vadd.f32 %v600_v45, %v567_v56  ;;  %v2799_v26 = vmul.f32 %v2106_v32, %v2085_v23  ;;  %v912_v39 = vmul.f32 %v2110_v34, %v3198_v14 }
  0xc1   : > { %v1252_v37 = vadd.f32 %v1201_v52, %v1131_v38  ;;  %v724_v40 = vrot.slane %v669_v27, 1  ;;  %v3154_v50 = vrot.slane %v2790_v46, 1  ;;  %v845_v48 = vrot.slane %v791_v6, 1 }
  0xc2   : > { %v649_v47 = vadd.f32 %v633_v58, %v616_v2  ;;  %v3149_v11 = vrot.slane %v2799_v26, 1  ;;  %v2807_v43 = vmul.f32 %v2110_v34, %v3203_v25  ;;  %v966_v54 = vrot.slane %v912_v39, 1 }
  0xc3   : > { %v1373_v56 = vadd.f32 %v1322_v62, %v1252_v37  ;;  %v726_v45 = vsel %vm708_vm3, %v724_v40, %v3154_v50  ;;  %v1033_v52 = vmul.f32 %v2112_v35, %v3209_v9  ;;  %v2816_v38 = vmul.f32 %v2112_v35, %v2339_v19 }
  0xc4   : > { %v771_v58 = vadd.f32 %v726_v45, %v649_v47  ;;  %v847_v2 = vsel %vm708_vm3, %v845_v48, %v3149_v11  ;;  %v3152_v27 = vrot.slane %v2807_v43, 1  ;;  %v1155_v6 = vmul.f32 %v2114_v36, %v3214_v63 }
  0xc5   : > { %v1393_v62 = vadd.f32 %v2227_v55, %v1373_v56  ;;  %v1088_v39 = vrot.slane %v1033_v52, 2  ;;  %v3151_v37 = vrot.slane %v2816_v38, 2  ;;  %v2828_v9 = vmul.f32 %v2114_v36, %v2085_v23 }
  0xc6   : > { %v892_v40 = vadd.f32 %v847_v2, %v771_v58  ;;  %v968_v47 = vsel %vm708_vm3, %v966_v54, %v3152_v27  ;;  %v1209_v48 = vrot.slane %v1155_v6, 2  ;;  %v1276_v45 = vmul.f32 %v2171_v3, %v3198_v14  ;;  %v2843_v2 = vld [vmem:[#allocation2 + $0x80] sm:$0xff] }
  0xc7   : > { %3215 = vst [vmem:[#allocation7_spill] sm:$0xff] %v2828_v9  ;;  %v1409_v11 = vmax.f32 %v1393_v62, 0.0  ;;  %v1090_v63 = vsel %vm1072_vm4, %v1088_v39, %v3151_v37  ;;  %v3150_v56 = vrot.slane %v2828_v9, 2  ;;  %v2841_v23 = vmul.f32 %v2171_v3, %v3203_v25 }
  0xc8   : > { %v1013_v52 = vadd.f32 %v968_v47, %v892_v40  ;;  %v1330_v58 = vrot.slane %v1276_v45, 2  ;;  %v572_v54 = vmul.f32 %v2843_v2, %v2100_v29  ;;  %v605_v14 = vmul.f32 %v2102_v30, %v2128_v42 }
  0xc9   : > { %3216 = vst [vmem:[#allocation14_spill] sm:$0xff] %v2841_v23  ;;  %1753 = vmatmul.msk.f32.gmra.mxu0 %vm445_vm0, %v1409_v11  ;;  %v1211_v6 = vsel %vm1072_vm4, %v1209_v48, %v3150_v56  ;;  %v3156_v62 = vrot.slane %v2841_v23, 2  ;;  %v638_v25 = vmul.f32 %v2108_v33, %v2189_v13  ;;  %v677_v39 = vmul.f32 %v2104_v31, %v2409_v1 }
  0xca   : > { %v1135_v40 = vadd.f32 %v1090_v63, %v1013_v52  ;;  %v621_v47 = vadd.f32 %v605_v14, %v572_v54  ;;  %v799_v45 = vmul.f32 %v2106_v32, %v2419_v18  ;;  %v920_v42 = vmul.f32 %v2110_v34, %v2448_v59 }
  0xcb   : > { %v1332_v11 = vsel %vm1072_vm4, %v1330_v58, %v3156_v62  ;;  %v737_v48 = vrot.slane %v677_v39, 1  ;;  %v1041_v56 = vmul.f32 %v2112_v35, %v2409_v1  ;;  %v1163_v37 = vmul.f32 %v2114_v36, %v2419_v18 }
  0xcc   : > { %v1256_v27 = vadd.f32 %v1211_v6, %v1135_v40  ;;  %v654_v63 = vadd.f32 %v638_v25, %v621_v47  ;;  %v858_v52 = vrot.slane %v799_v45, 1  ;;  %v979_v54 = vrot.slane %v920_v42, 1  ;;  %v556_v25 = vld [vmem:[#allocation2 + $0xe8] sm:$0x3] }
  0xcd   : > { %v3217_v14 = vrot.slane %v2585_v17, 1  ;;  %v1101_v50 = vrot.slane %v1041_v56, 2  ;;  %v1222_v9 = vrot.slane %v1163_v37, 2  ;;  %v1284_v58 = vmul.f32 %v2171_v3, %v2448_v59 }
  0xce   : > { %v642_v39 = vmul.f32 %v2108_v33, %v2649_v4  ;;  %v1377_v62 = vadd.f32 %v1332_v11, %v1256_v27  ;;  %v3218_v18 = vrot.slane %v2595_v0, 1  ;;  %v3219_v40 = vrot.slane %v2603_v49, 1 }
  0xcf   : > { %v738_v28 = vsel %vm708_vm3, %v3217_v14, %v737_v48  ;;  %v3220_v56 = vrot.slane %v2612_v60, 2  ;;  %v3221_v47 = vrot.slane %v2627_v8, 2  ;;  %v576_v4 = vmul.f32 %v2100_v29, %v2189_v13 }
  0xd0   : > { %v776_v23 = vadd.f32 %v738_v28, %v654_v63  ;;  %v859_v6 = vsel %vm708_vm3, %v3218_v18, %v858_v52  ;;  %v980_v17 = vsel %vm708_vm3, %v3219_v40, %v979_v54  ;;  %v1397_v0 = vadd.f32 %v2227_v55, %v1377_v62 }
  0xd1   : > { %v1102_v37 = vsel %vm1072_vm4, %v3220_v56, %v1101_v50  ;;  %v1223_v45 = vsel %vm1072_vm4, %v3221_v47, %v1222_v9  ;;  %v609_v27 = vmul.f32 %v2102_v30, %v2199_v21  ;;  %v683_v49 = vmul.f32 %v2104_v31, %v2448_v59 }
  0xd2   : > { %v897_v28 = vadd.f32 %v859_v6, %v776_v23  ;;  %v1343_v42 = vrot.slane %v1284_v58, 2  ;;  %v805_v60 = vmul.f32 %v2106_v32, %v2450_v41  ;;  %v926_v8 = vmul.f32 %v2110_v34, %v556_v25 }
  0xd3   : > { %v1047_v50 = vmul.f32 %v2112_v35, %v2448_v59  ;;  %v1413_v9 = vmax.f32 %v1397_v0, 0.0  ;;  %v625_v11 = vadd.f32 %v609_v27, %v576_v4  ;;  %v747_v62 = vrot.slane %v683_v49, 1 }
  0xd4   : > { %v1018_v13 = vadd.f32 %v980_v17, %v897_v28  ;;  %v868_v23 = vrot.slane %v805_v60, 1  ;;  %v989_v48 = vrot.slane %v926_v8, 1  ;;  %v1169_v21 = vmul.f32 %v2114_v36, %v2450_v41 }
  0xd5   : > { %v1111_v63 = vrot.slane %v1047_v50, 2  ;;  %1757 = vmatmul.msk.f32.gmra.mxu1 %vm445_vm0, %v1413_v9  ;;  %v658_v54 = vadd.f32 %v642_v39, %v625_v11  ;;  %v3222_v14 = vrot.slane %v2659_v7, 1  ;;  %v1290_v59 = vmul.f32 %v2171_v3, %v556_v25 }
  0xd6   : > { %v1140_v52 = vadd.f32 %v1102_v37, %v1018_v13  ;;  %v3223_v18 = vrot.slane %v2637_v22, 2  ;;  %v3224_v40 = vrot.slane %v2665_v12, 1  ;;  %v3225_v41 = vrot.slane %v2671_v44, 1 }
  0xd7   : > { %v748_v58 = vsel %vm708_vm3, %v3222_v14, %v747_v62  ;;  %v1232_v37 = vrot.slane %v1169_v21, 2  ;;  %v3226_v7 = vrot.slane %v2682_v15, 2  ;;  %v564_v22 = vmul.f32 %v2100_v29, %v2264_v53 }
  0xd8   : > { %v1344_v6 = vsel %vm1072_vm4, %v3223_v18, %v1343_v42  ;;  %v869_v17 = vsel %vm708_vm3, %v3224_v40, %v868_v23  ;;  %v990_v56 = vsel %vm708_vm3, %v3225_v41, %v989_v48  ;;  %v1261_v39 = vadd.f32 %v1223_v45, %v1140_v52  ;;  %v3233_v40 = vld [vmem:[#allocation13_spill] sm:$0xff]  ;;  %v1818_v41 = vld [vmem:[#allocation2 + $0x68] sm:$0xff] }
  0xd9   : > { %v780_v47 = vadd.f32 %v748_v58, %v658_v54  ;;  %v1112_v4 = vsel %vm1072_vm4, %v3226_v7, %v1111_v63  ;;  %v1353_v25 = vrot.slane %v1290_v59, 2  ;;  %v597_v12 = vmul.f32 %v2102_v30, %v2284_v16  ;;  %v3231_v58 = vld [vmem:[#allocation12_spill] sm:$0xff] }
  0xda   : > { %v630_v0 = vmul.f32 %v2108_v33, %v2339_v19  ;;  %v665_v44 = vmul.f32 %v2104_v31, %v2490_v57  ;;  %v1382_v28 = vadd.f32 %v1344_v6, %v1261_v39  ;;  %v3227_v27 = vrot.slane %v2696_v10, 2 }
  0xdb   : > { %v901_v45 = vadd.f32 %v869_v17, %v780_v47  ;;  %v787_v49 = vmul.f32 %v2106_v32, %v2506_v20  ;;  %v613_v53 = vadd.f32 %v597_v12, %v564_v22  ;;  %v908_v16 = vmul.f32 %v2110_v34, %v2531_v51 }
  0xdc   : > { %v1233_v15 = vsel %vm1072_vm4, %v3227_v27, %v1232_v37  ;;  %v717_v42 = vrot.slane %v665_v44, 1  ;;  %v1029_v60 = vmul.f32 %v2112_v35, %v2490_v57  ;;  %v1402_v8 = vadd.f32 %v2227_v55, %v1382_v28 }
  0xdd   : > { %v1022_v50 = vadd.f32 %v990_v56, %v901_v45  ;;  %v838_v9 = vrot.slane %v787_v49, 1  ;;  %v1151_v10 = vmul.f32 %v2114_v36, %v2506_v20  ;;  %v646_v13 = vadd.f32 %v630_v0, %v613_v53 }
  0xde   : > { %v3228_v11 = vrot.slane %v2722_v24, 1  ;;  %v959_v23 = vrot.slane %v908_v16, 1  ;;  %v1081_v48 = vrot.slane %v1029_v60, 2  ;;  %v1418_v63 = vmax.f32 %v1402_v8, 0.0  ;;  %v3239_v60 = vld [vmem:[#allocation6_spill] sm:$0xff] }
  0xdf   : > { %v1144_v21 = vadd.f32 %v1112_v4, %v1022_v50  ;;  %v3229_v52 = vrot.slane %v2701_v61, 2  ;;  %v3230_v55 = vrot.slane %v2731_v5, 1  ;;  %v3232_v20 = vrot.slane %v3231_v58, 1  ;;  %v3246_v58 = vld [vmem:[#allocation14_spill] sm:$0xff] }
  0xe0   : > { %v718_v62 = vsel %vm708_vm3, %v3228_v11, %v717_v42  ;;  %v1202_v24 = vrot.slane %v1151_v10, 2  ;;  %v1272_v18 = vmul.f32 %v2171_v3, %v2531_v51  ;;  %1762 = vmatmul.msk.f32.gmra.mxu2 %vm445_vm0, %v1418_v63  ;;  %v3234_v61 = vrot.slane %v3233_v40, 2 }
  0xe1   : > { %v1354_v57 = vsel %vm1072_vm4, %v3229_v52, %v1353_v25  ;;  %v839_v54 = vsel %vm708_vm3, %v3230_v55, %v838_v9  ;;  %v768_v14 = vadd.f32 %v718_v62, %v646_v13  ;;  %v960_v59 = vsel %vm708_vm3, %v3232_v20, %v959_v23  ;;  %v3235_v25 = vld [vmem:[#allocation15_spill] sm:$0xff] }
  0xe2   : > { %v1265_v6 = vadd.f32 %v1233_v15, %v1144_v21  ;;  %v1082_v17 = vsel %vm1072_vm4, %v3234_v61, %v1081_v48  ;;  %v568_v5 = vmul.f32 %v2100_v29, %v2339_v19  ;;  %v601_v56 = vmul.f32 %v1818_v41, %v2102_v30  ;;  %v3236_v19 = vld [vmem:[#allocation4_spill] sm:$0xff] }
  0xe3   : > { %v889_v37 = vadd.f32 %v839_v54, %v768_v14  ;;  %v1323_v39 = vrot.slane %v1272_v18, 2  ;;  %v634_v47 = vmul.f32 %v2843_v2, %v2108_v33  ;;  %v671_v7 = vmul.f32 %v2104_v31, %v2531_v51  ;;  %v1819_v31 = vld [vmem:[%s3076_s4] ss:$0 sm:$0xff] }
  0xe4   : > { %v1386_v4 = vadd.f32 %v1354_v57, %v1265_v6  ;;  %v617_v22 = vadd.f32 %v601_v56, %v568_v5  ;;  %v793_v12 = vmul.f32 %v2106_v32, %v3235_v25  ;;  %v914_v0 = vmul.f32 %v2110_v34, %v2409_v1  ;;  %v3244_v57 = vld [vmem:[#allocation7_spill] sm:$0xff] }
  0xe5   : > { %v1010_v29 = vadd.f32 %v960_v59, %v889_v37  ;;  %v3237_v44 = vrot.slane %v3236_v19, 2  ;;  %v727_v28 = vrot.slane %v671_v7, 1  ;;  %v1035_v33 = vmul.f32 %v2112_v35, %v2531_v51 }
  0xe6   : > { %v1406_v2 = vadd.f32 %v1819_v31, %v1386_v4  ;;  %v650_v45 = vadd.f32 %v634_v47, %v617_v22  ;;  %v848_v27 = vrot.slane %v793_v12, 1  ;;  %v969_v32 = vrot.slane %v914_v0, 1 }
  0xe7   : > { %v1203_v30 = vsel %vm1072_vm4, %v3237_v44, %v1202_v24  ;;  %v1132_v15 = vadd.f32 %v1082_v17, %v1010_v29  ;;  %v3238_v34 = vrot.slane %v2790_v46, 1  ;;  %v1091_v53 = vrot.slane %v1035_v33, 2 }
  0xe8   : > { %v1157_v42 = vmul.f32 %v2114_v36, %v3235_v25  ;;  %v1422_v16 = vmax.f32 %v1406_v2, 0.0  ;;  %v3240_v35 = vrot.slane %v3239_v60, 2  ;;  %v3241_v50 = vrot.slane %v2799_v26, 1 }
  0xe9   : > { %v728_v49 = vsel %vm708_vm3, %v3238_v34, %v727_v28  ;;  %v1253_v10 = vadd.f32 %v1203_v30, %v1132_v15  ;;  %v3242_v13 = vrot.slane %v2807_v43, 1  ;;  %v1278_v62 = vmul.f32 %v2171_v3, %v2409_v1  ;;  %v1521_v24 = vpop.f32.mrf.mxu2 }
  0xea   : > { %v1324_v51 = vsel %vm1072_vm4, %v3240_v35, %v1323_v39  ;;  %v772_v8 = vadd.f32 %v728_v49, %v650_v45  ;;  %v849_v9 = vsel %vm708_vm3, %v3241_v50, %v848_v27  ;;  %v1212_v11 = vrot.slane %v1157_v42, 2  ;;  %1766 = vmatmul.msk.f32.gmra.mxu3 %vm445_vm0, %v1422_v16 }
  0xeb   : > { %v970_v46 = vsel %vm708_vm3, %v3242_v13, %v969_v32  ;;  %v1374_v23 = vadd.f32 %v1324_v51, %v1253_v10  ;;  %v3243_v48 = vrot.slane %v2816_v38, 2  ;;  %v1333_v26 = vrot.slane %v1278_v62, 2  ;;  %v3005_v38 = vld [vmem:[%s3078_s6] ss:$0 sm:$0xff] }
  0xec   : > { %v893_v36 = vadd.f32 %v849_v9, %v772_v8  ;;  %v3245_v43 = vrot.slane %v3244_v57, 2  ;;  %v3247_v3 = vrot.slane %v3246_v58, 2  ;;  %v1522_v18 = vadd.f32 %v3005_v38, %v1521_v24 }
  0xed   : > { %v1092_v63 = vsel %vm1072_vm4, %v3243_v48, %v1091_v53  ;;  %v1394_v52 = vadd.f32 %v1819_v31, %v1374_v23  ;;  %vm1561_vm5 = vcmask 64512  }
  0xee   : > { %v1014_v21 = vadd.f32 %v970_v46, %v893_v36  ;;  %v1213_v55 = vsel %vm1072_vm4, %v3245_v43, %v1212_v11  ;;  %v1334_v1 = vsel %vm1072_vm4, %v3247_v3, %v1333_v26  ;;  %v1553_v40 = vmax.f32 %v1522_v18, 0.0 }
  0xef   : > { %v1410_v14 = vmax.f32 %v1394_v52, 0.0 }
  0xf0   : > { %v1136_v54 = vadd.f32 %v1092_v63, %v1014_v21  ;;  %1570 = vst.msk [vmem:[%s2015_s17 + $0x40] sm:$0xff] %vm1561_vm5, %v1553_v40 }
  0xf1   : > { %1754 = vmatmul.msk.f32.gmra.mxu0 %vm445_vm0, %v1410_v14  ;;  %v1533_v17 = vpop.f32.mrf.mxu3 }
  0xf2   : > { %v1257_v20 = vadd.f32 %v1213_v55, %v1136_v54  ;;  %v1534_v5 = vadd.f32 %v3005_v38, %v1533_v17 }
  0xf4   : > { %v1378_v59 = vadd.f32 %v1334_v1, %v1257_v20  ;;  %v1557_v41 = vmax.f32 %v1534_v5, 0.0 }
  0xf6   : > { %v1398_v6 = vadd.f32 %v1819_v31, %v1378_v59  ;;  %1574 = vst.msk [vmem:[%s2015_s17 + $0x60] sm:$0xff] %vm1561_vm5, %v1557_v41 }
  0xf7   : > { %v1497_v56 = vpop.f32.mrf.mxu0 }
  0xf8   : > { %v1414_v61 = vmax.f32 %v1398_v6, 0.0  ;;  %v1498_v37 = vadd.f32 %v3005_v38, %v1497_v56 }
  0xfa   : > { %1758 = vmatmul.msk.f32.gmra.mxu1 %vm445_vm0, %v1414_v61  ;;  %v1545_v39 = vmax.f32 %v1498_v37, 0.0 }
  0xfc   : > { %1562 = vst.msk [vmem:[%s2015_s17] sm:$0xff] %vm1561_vm5, %v1545_v39 }
 0x102   : > { %v1509_v47 = vpop.f32.mrf.mxu1 }
 0x103   : > { %v1510_v7 = vadd.f32 %v3005_v38, %v1509_v47 }
 0x105   : > { %v1549_v4 = vmax.f32 %v1510_v7, 0.0 }
 0x107   : > { %1566 = vst.msk [vmem:[%s2015_s17 + $0x20] sm:$0xff] %vm1561_vm5, %v1549_v4 }
 0x114   : > { %v1524_v22 = vpop.f32.mrf.mxu2 }
 0x115   : > { %v1525_v25 = vadd.f32 %v3005_v38, %v1524_v22 }
 0x117   : > { %v1554_v12 = vmax.f32 %v1525_v25, 0.0 }
 0x119   : > { %1571 = vst.msk [vmem:[%s2015_s17 + $0x48] sm:$0xff] %vm1561_vm5, %v1554_v12 }
 0x11d   : > { %v1536_v0 = vpop.f32.mrf.mxu3 }
 0x11e   : > { %v1537_v19 = vadd.f32 %v3005_v38, %v1536_v0 }
 0x11f   : > { %v1500_v29 = vpop.f32.mrf.mxu0 }
 0x120   : > { %v1501_v44 = vadd.f32 %v3005_v38, %v1500_v29  ;;  %v1558_v30 = vmax.f32 %v1537_v19, 0.0 }
 0x122   : > { %v1546_v28 = vmax.f32 %v1501_v44, 0.0  ;;  %1575 = vst.msk [vmem:[%s2015_s17 + $0x68] sm:$0xff] %vm1561_vm5, %v1558_v30 }
 0x124   : > { %1563 = vst.msk [vmem:[%s2015_s17 + $0x8] sm:$0xff] %vm1561_vm5, %v1546_v28 }
 0x128   : > { %v1512_v33 = vpop.f32.mrf.mxu1 }
 0x129   : > { %v1513_v31 = vadd.f32 %v3005_v38, %v1512_v33 }
 0x12b   : > { %v1550_v2 = vmax.f32 %v1513_v31, 0.0 }
 0x12d   : > { %1567 = vst.msk [vmem:[%s2015_s17 + $0x28] sm:$0xff] %vm1561_vm5, %v1550_v2 }
 0x136   : > { %v1527_v45 = vpop.f32.mrf.mxu2 }
 0x137   : > { %v1528_v27 = vadd.f32 %v3005_v38, %v1527_v45 }
 0x139   : > { %v1555_v32 = vmax.f32 %v1528_v27, 0.0 }
 0x13b   : > { %1572 = vst.msk [vmem:[%s2015_s17 + $0x50] sm:$0xff] %vm1561_vm5, %v1555_v32 }
 0x142   : > { %v1539_v15 = vpop.f32.mrf.mxu3 }
 0x143   : > { %v1540_v34 = vadd.f32 %v3005_v38, %v1539_v15 }
 0x145   : > { %v1559_v49 = vmax.f32 %v1540_v34, 0.0 }
 0x146   : > { %v1503_v53 = vpop.f32.mrf.mxu0 }
 0x147   : > { %v1504_v42 = vadd.f32 %v3005_v38, %v1503_v53  ;;  %1576 = vst.msk [vmem:[%s2015_s17 + $0x70] sm:$0xff] %vm1561_vm5, %v1559_v49 }
 0x149   : > { %v1547_v16 = vmax.f32 %v1504_v42, 0.0 }
 0x14b   : > { %1564 = vst.msk [vmem:[%s2015_s17 + $0x10] sm:$0xff] %vm1561_vm5, %v1547_v16 }
 0x152   : > { %v1515_v60 = vpop.f32.mrf.mxu1 }
 0x153   : > { %v1516_v35 = vadd.f32 %v3005_v38, %v1515_v60 }
 0x155   : > { %v1551_v51 = vmax.f32 %v1516_v35, 0.0 }
 0x157   : > { %1568 = vst.msk [vmem:[%s2015_s17 + $0x30] sm:$0xff] %vm1561_vm5, %v1551_v51 }
 0x163   : > { %v1530_v8 = vpop.f32.mrf.mxu2 }
 0x164   : > { %v1531_v50 = vadd.f32 %v3005_v38, %v1530_v8 }
 0x166   : > { %v1556_v9 = vmax.f32 %v1531_v50, 0.0 }
 0x168   : > { %1573 = vst.msk [vmem:[%s2015_s17 + $0x58] sm:$0xff] %vm1561_vm5, %v1556_v9 }
 0x16d   : > { %v1542_v10 = vpop.f32.mrf.mxu3 }
 0x16e   : > { %v1506_v13 = vpop.f32.mrf.mxu0  ;;  %v1543_v46 = vadd.f32 %v3005_v38, %v1542_v10 }
 0x16f   : > { %v1507_v11 = vadd.f32 %v3005_v38, %v1506_v13 }
 0x170   : > { %v1560_v62 = vmax.f32 %v1543_v46, 0.0 }
 0x171   : > { %v1548_v36 = vmax.f32 %v1507_v11, 0.0 }
 0x172   : > { %1577 = vst.msk [vmem:[%s2015_s17 + $0x78] sm:$0xff] %vm1561_vm5, %v1560_v62 }
 0x173   : > { %1565 = vst.msk [vmem:[%s2015_s17 + $0x18] sm:$0xff] %vm1561_vm5, %v1548_v36 }
 0x177   : > { %v1518_v23 = vpop.f32.mrf.mxu1 }
 0x178   : > { %v1519_v48 = vadd.f32 %v3005_v38, %v1518_v23 }
 0x17a   : > { %v1552_v63 = vmax.f32 %v1519_v48, 0.0 }
 0x17c   : > { %1569 = vst.msk [vmem:[%s2015_s17 + $0x38] sm:$0xff] %vm1561_vm5, %v1552_v63 }
 0x17d PF: > { %s17_s28 = sadd.s32 1, %s1858_s28   ;;  %s3248_s24 = smov %s1850_s26 }
 0x17e   : > { %p14_p13 = scmp.ge.s32.totalorder %s17_s28, 6   ;;  %s3249_s25 = smov %s1854_s27 }
 0x17f   : > { %s3250_s26 = smov %s3253_s29  ;;  %s3251_s27 = smov %s3257_s30 }
 0x180   :  { %16 = sbr.rel (!%p14_p13) target bundleno = 3 (0x3), region = 94 }

</bundles_post_ra>
